<compile_context>
chip_gen: v6e
topology: v6e:2x2x1
jax: 0.10.0
libtpu: 0.0.40
codegen_flags: <defaults>
</compile_context>

<pallas_src>
import functools

import jax
import jax.numpy as jnp
from jax.experimental import pallas as pl
from jax.experimental.pallas import tpu as pltpu

_SUBLANE_ALIGN = 16  # row counts multiple of 16 -> tile-aligned reshapes for f32 AND bf16


def _round_up(x, m):
    return (x + m - 1) // m * m


# ----------------------------- Pallas kernel ------------------------------- #
def _cnn_pos_kernel(x_ref, w1_ref, posb_ref, w2_ref, b2_ref, out_ref, *,
                    window_size, sen_len, pool_dtype):
    """One grid step = `block_b` batch elements, full sequences resident in VMEM."""
    ws = window_size
    Bt, Hp1, d_w = x_ref.shape                 # x_ref: (block_b, Hp1, d_w), Hp1 % 16 == 0
    nf = w1_ref.shape[2]                       # num_filter
    nf2 = w2_ref.shape[2]                      # num_filter // 2
    mm_dtype = w1_ref.dtype                    # matmul operand dtype (bf16 or f32)

    H1 = sen_len + 2 - ws + 1                  # conv1 valid output rows
    H2 = H1 - ws + 1                           # maxpool1 output rows
    H3 = H2 + 2 - ws + 1                       # conv2 valid output rows

    # ---- conv1 (word part): per-tap weight-stationary matmuls ----
    # x_ref already holds [zero, word(0..sen_len-1), zero, align-zeros] along the
    # row axis (built by the gather in the wrapper), so no in-kernel pad copy and
    # the (Bt, Hp1, d_w) -> (Bt*Hp1, d_w) flatten is sublane-tile aligned.
    xp2d = x_ref[...].reshape(Bt * Hp1, d_w)
    c1 = None
    for kh in range(ws):
        y = jnp.dot(xp2d, w1_ref[kh],
                    preferred_element_type=jnp.float32).reshape(Bt, Hp1, nf)
        y = y[:, kh:kh + H1, :]
        c1 = y if c1 is None else c1 + y
    # Batch-invariant positional-embedding contribution (+ b1), precomputed in f32.
    c1 = (c1 + posb_ref[...][None]).astype(pool_dtype)          # (Bt, H1, nf)

    # ---- MaxPool2d((ws, 1), stride 1) along the sequence axis (VPU) ----
    m1 = c1[:, 0:H2, :]
    for kh in range(1, ws):
        m1 = jnp.maximum(m1, c1[:, kh:kh + H2, :])              # (Bt, H2, nf)

    # ---- transpose(1,3) + conv2: same per-tap weight-stationary scheme ----
    rows2 = H2 + 2                                              # 1 zero row each side
    Hp2 = _round_up(rows2, _SUBLANE_ALIGN)                      # tail zeros never read back
    m1p = jnp.concatenate(
        [jnp.zeros((Bt, 1, nf), pool_dtype), m1,
         jnp.zeros((Bt, Hp2 - rows2 + 1, nf), pool_dtype)], axis=1)   # (Bt, Hp2, nf)
    m1p2d = m1p.reshape(Bt * Hp2, nf).astype(mm_dtype)
    c2 = None
    for kh in range(ws):
        y = jnp.dot(m1p2d, w2_ref[kh],
                    preferred_element_type=jnp.float32).reshape(Bt, Hp2, nf2)
        y = y[:, kh:kh + H3, :]
        c2 = y if c2 is None else c2 + y                        # (Bt, H3, nf2), f32

    # ---- MaxPool2d((150 - ws + 1, 1)) == global max over the sequence axis ----
    # b2 is constant over the pooled axis -> hoisted past the max (tiny add).
    out_ref[...] = (jnp.max(c2, axis=1) + b2_ref[...]).astype(out_ref.dtype)


# ------------------------------- wrapper ------------------------------------ #
def _tpu_defaults(compute_dtype):
    """Per-generation defaults: (block_b, vmem_limit_bytes, pooling dtype)."""
    kind = ""
    try:
        kind = jax.devices()[0].device_kind.lower()
    except Exception:
        pass
    if jnp.dtype(compute_dtype) == jnp.dtype(jnp.float32):
        pool = jnp.float32
    elif ("v5 lite" in kind) or ("v5e" in kind) or ("v5lite" in kind):
        pool = jnp.float32          # v5e VPU has no native bf16 elementwise path
    else:
        pool = jnp.bfloat16         # v6e / v7x: bf16 VALU halves VPU + VMEM cost
    if "v7" in kind:
        return 32, 48 << 20, pool   # 64 MiB VMEM chip: smaller block, keep >=2 grid steps
    return 64, 96 << 20, pool       # v5e / v6e (128 MiB VMEM)


def cnn_pos_forward(x_idx, params, *, window_size, block_b=None,
                    compute_dtype=jnp.bfloat16, pool_dtype=None,
                    vmem_limit_bytes=None):
    """x_idx: (B, sen_len) int32 token ids. Returns (B, num_classes) float32."""
    B, sen_len = x_idx.shape
    w2v = params["w2v"]                 # (vocab, d_w)
    pos_emb = params["pos_emb"]         # (150, d_b)
    d_w, d_b = w2v.shape[1], pos_emb.shape[1]
    D = d_w + d_b
    ws = window_size
    vocab = w2v.shape[0]

    nf = params["w1"].shape[0]          # num_filter
    nf2 = params["w2"].shape[0]         # num_filter // 2

    # Shape consistency of the original module (flatten -> Linear(nf2, ncls)):
    H1 = sen_len + 2 - ws + 1
    H2 = H1 - ws + 1
    H3 = H2 + 2 - ws + 1
    assert H3 == 150 - ws + 1, "module only shape-consistent for sen_len == 144 + 2*window_size"

    db_block, db_vmem, db_pool = _tpu_defaults(compute_dtype)
    block_b = db_block if block_b is None else block_b
    pool_dtype = db_pool if pool_dtype is None else pool_dtype
    vmem_limit_bytes = db_vmem if vmem_limit_bytes is None else vmem_limit_bytes
    if jnp.dtype(compute_dtype) == jnp.dtype(jnp.float32):
        pool_dtype = jnp.float32

    # Batch coarsening: block_b elements per grid step (multiple of 8 when tiled).
    block_b = max(1, min(block_b, B))
    if block_b < B:
        block_b = max(8, (block_b // 8) * 8)
    B_pad = pl.cdiv(B, block_b) * block_b

    # Word-embedding gather: cast the TABLE to compute dtype (half the gather HBM
    # bytes), and gather directly into the conv1 zero-padded, sublane-aligned row
    # layout via a sentinel zero row -> no pad pass, no in-kernel pad copy.
    Hp1 = _round_up(sen_len + 2, _SUBLANE_ALIGN)
    w2v_aug = jnp.concatenate(
        [w2v.astype(compute_dtype), jnp.zeros((1, d_w), compute_dtype)], axis=0)
    idx = jnp.full((B_pad, Hp1), vocab, jnp.int32)               # sentinel = zero row
    idx = idx.at[:B, 1:1 + sen_len].set(x_idx.astype(jnp.int32))
    word = jnp.take(w2v_aug, idx, axis=0)                        # (B_pad, Hp1, d_w)

    # Batch-invariant positional-embedding contribution to conv1 (+ b1), in f32.
    w1r = params["w1"].reshape(nf, ws, D)
    w1_taps = jnp.transpose(w1r[:, :, :d_w], (1, 2, 0)).astype(compute_dtype)  # (ws, d_w, nf)
    w1_pos = w1r[:, :, d_w:].reshape(nf, ws * d_b).T.astype(jnp.float32)       # (ws*d_b, nf)
    pos_pad = jnp.pad(pos_emb[:sen_len].astype(jnp.float32), ((1, 1), (0, 0)))
    pos_slab = jnp.concatenate([pos_pad[kh:kh + H1] for kh in range(ws)], axis=1)
    pos_bias = (jnp.dot(pos_slab, w1_pos, precision=jax.lax.Precision.HIGHEST)
                + params["b1"][None, :].astype(jnp.float32))                   # (H1, nf)

    w2_taps = jnp.transpose(params["w2"].reshape(nf2, ws, nf),
                            (1, 2, 0)).astype(compute_dtype)                   # (ws, nf, nf2)
    b2m = params["b2"].reshape(1, nf2).astype(jnp.float32)

    kernel = functools.partial(_cnn_pos_kernel, window_size=ws,
                               sen_len=sen_len, pool_dtype=pool_dtype)
    pooled = pl.pallas_call(
        kernel,
        out_shape=jax.ShapeDtypeStruct((B_pad, nf2), jnp.float32),
        grid=(B_pad // block_b,),
        in_specs=[
            pl.BlockSpec((block_b, Hp1, d_w), lambda b: (b, 0, 0)),  # padded word embeddings
            pl.BlockSpec((ws, d_w, nf), lambda b: (0, 0, 0)),        # conv1 word-weight taps
            pl.BlockSpec((H1, nf), lambda b: (0, 0)),                # pos contribution + b1
            pl.BlockSpec((ws, nf, nf2), lambda b: (0, 0, 0)),        # conv2 weight taps
            pl.BlockSpec((1, nf2), lambda b: (0, 0)),                # b2
        ],
        out_specs=pl.BlockSpec((block_b, nf2), lambda b: (b, 0)),
        compiler_params=pltpu.CompilerParams(
            dimension_semantics=("parallel",),
            vmem_limit_bytes=vmem_limit_bytes),
    )(word, w1_taps, pos_bias, w2_taps, b2m)

    # Final tiny Linear(nf2, ncls) as one dense XLA matmul (keeps the kernel's
    # output store lane-dense instead of a per-element masked 2-lane store).
    logits = (jnp.dot(pooled[:B], params["w3"].T.astype(jnp.float32),
                      precision=jax.lax.Precision.HIGHEST)
              + params["b3"][None, :])
    return logits


# ------------------------- pure-JAX (NCHW) reference ------------------------ #
def cnn_pos_forward_ref(x_idx, params, *, window_size):
    B, sen_len = x_idx.shape
    w2v, pos_emb = params["w2v"], params["pos_emb"]
    word = jnp.take(w2v, x_idx, axis=0)
    pos = jnp.broadcast_to(jnp.take(pos_emb, jnp.arange(sen_len), axis=0)[None],
                           (B, sen_len, pos_emb.shape[1]))
    x = jnp.concatenate([word, pos], axis=2)[:, None].astype(jnp.float32)   # NCHW
    c1 = jax.lax.conv_general_dilated(
        x, params["w1"], (1, 1), ((1, 1), (0, 0)),
        dimension_numbers=("NCHW", "OIHW", "NCHW"),
        precision=jax.lax.Precision.HIGHEST) + params["b1"][None, :, None, None]
    m1 = jax.lax.reduce_window(c1, -jnp.inf, jax.lax.max,
                               (1, 1, window_size, 1), (1, 1, 1, 1), "VALID")
    t = jnp.transpose(m1, (0, 3, 2, 1))
    c2 = jax.lax.conv_general_dilated(
        t, params["w2"], (1, 1), ((1, 1), (0, 0)),
        dimension_numbers=("NCHW", "OIHW", "NCHW"),
        precision=jax.lax.Precision.HIGHEST) + params["b2"][None, :, None, None]
    pool2 = 150 - window_size + 1
    m2 = jax.lax.reduce_window(c2, -jnp.inf, jax.lax.max,
                               (1, 1, pool2, 1), (1, 1, 1, 1), "VALID")
    flat = m2.reshape(B, -1)
    return flat @ params["w3"].T + params["b3"]


# ------------------------------ param init ---------------------------------- #
def _xavier_uniform(key, shape, fan_in, fan_out):
    a = (6.0 / (fan_in + fan_out)) ** 0.5
    return jax.random.uniform(key, shape, jnp.float32, -a, a)


def init_params(key, *, vocab, d_w, d_b, num_filter, window_size, num_classes):
    D = d_w + d_b
    nf2 = num_filter // 2
    k = jax.random.split(key, 5)
    return {
        "w2v": jax.random.normal(k[0], (vocab, d_w), jnp.float32),          # pretrained emb
        "pos_emb": jax.random.normal(k[1], (150, d_b), jnp.float32),        # nn.Embedding(150, d_b)
        "w1": _xavier_uniform(k[2], (num_filter, 1, window_size, D),
                              window_size * D, num_filter * window_size * D),
        "b1": jnp.zeros((num_filter,), jnp.float32),
        "w2": _xavier_uniform(k[3], (nf2, 1, window_size, num_filter),
                              window_size * num_filter, nf2 * window_size * num_filter),
        "b2": jnp.zeros((nf2,), jnp.float32),
        "w3": _xavier_uniform(k[4], (num_classes, nf2), nf2, num_classes),
        "b3": jnp.zeros((num_classes,), jnp.float32),
    }


if __name__ == "__main__":
    # Small-but-consistent config: the module hard-codes a 150-row pos table and a
    # (150 - ws + 1)-tall second max-pool, which forces sen_len == 144 + 2*ws.
    d_w, d_b = 24, 8
    num_filter = 32
    window_size = 3
    num_classes = 2
    vocab = 50
    batch = 2
    sen_len = 144 + 2 * window_size   # = 150

    root = jax.random.PRNGKey(0)
    pkey, xkey = jax.random.split(root)
    params = init_params(pkey, vocab=vocab, d_w=d_w, d_b=d_b,
                         num_filter=num_filter, window_size=window_size,
                         num_classes=num_classes)
    x = jax.random.randint(xkey, (batch, sen_len), 0, vocab, dtype=jnp.int32)

    ref = jax.block_until_ready(cnn_pos_forward_ref(x, params, window_size=window_size))

    # Performance path: bf16 MXU operands, f32 accumulation. Exercise both pooling
    # dtypes (bf16 default on v6e/v7x, f32 on v5e) regardless of the chip we're on.
    for pd in (jnp.bfloat16, jnp.float32):
        out = jax.block_until_ready(
            cnn_pos_forward(x, params, window_size=window_size,
                            compute_dtype=jnp.bfloat16, pool_dtype=pd))
        assert out.shape == (batch, num_classes)
        assert jnp.allclose(out, ref, rtol=3e-2, atol=3e-2), (pd, out, ref)

    # Auto defaults (per-generation block_b / vmem limit / pooling dtype).
    out_auto = jax.block_until_ready(
        cnn_pos_forward(x, params, window_size=window_size))
    assert jnp.allclose(out_auto, ref, rtol=3e-2, atol=3e-2), (out_auto, ref)

    # Full-precision path: tight check against the HIGHEST-precision reference.
    out_f32 = jax.block_until_ready(
        cnn_pos_forward(x, params, window_size=window_size,
                        compute_dtype=jnp.float32))
    assert jnp.allclose(out_f32, ref, rtol=2e-3, atol=2e-3), (out_f32, ref)

    print("KERNEL_OK")
</pallas_src>

<mosaic_0001>
module attributes {stable_mosaic.version = 11 : i64} {
  func.func @_cnn_pos_kernel(%arg0: i32, %arg1: memref<2x160x24xbf16, #tpu.memory_space<vmem>>, %arg2: memref<3x24x32xbf16, #tpu.memory_space<vmem>>, %arg3: memref<150x32xf32, #tpu.memory_space<vmem>>, %arg4: memref<3x32x16xbf16, #tpu.memory_space<vmem>>, %arg5: memref<1x16xf32, #tpu.memory_space<vmem>>, %arg6: memref<2x16xf32, #tpu.memory_space<vmem>>) attributes {dimension_semantics = [#tpu.dimension_semantics<parallel>], iteration_bounds = array<i64: 1>, scalar_prefetch = 0 : i64, scratch_operands = 0 : i64, tpu.core_type = #tpu.core_type<tc>, window_params = [{transform_indices = @transform_0, window_bounds = array<i64: 2, 160, 24>}, {pipeline_mode = #tpu.pipeline_mode<synchronous>, transform_indices = @transform_1, window_bounds = array<i64: 3, 24, 32>}, {pipeline_mode = #tpu.pipeline_mode<synchronous>, transform_indices = @transform_2, window_bounds = array<i64: 150, 32>}, {pipeline_mode = #tpu.pipeline_mode<synchronous>, transform_indices = @transform_3, window_bounds = array<i64: 3, 32, 16>}, {pipeline_mode = #tpu.pipeline_mode<synchronous>, transform_indices = @transform_4, window_bounds = array<i64: 1, 16>}, {transform_indices = @transform_5, window_bounds = array<i64: 2, 16>}]} {
    %c0 = arith.constant 0 : index
    %c0_0 = arith.constant 0 : index
    %c0_1 = arith.constant 0 : index
    %0 = vector.load %arg1[%c0, %c0_0, %c0_1] : memref<2x160x24xbf16, #tpu.memory_space<vmem>>, vector<2x160x24xbf16>
    %1 = vector.shape_cast %0 : vector<2x160x24xbf16> to vector<320x24xbf16>
    %c0_2 = arith.constant 0 : index
    %c0_3 = arith.constant 0 : index
    %c0_4 = arith.constant 0 : index
    %2 = vector.load %arg2[%c0_2, %c0_3, %c0_4] : memref<3x24x32xbf16, #tpu.memory_space<vmem>>, vector<1x24x32xbf16>
    %3 = vector.shape_cast %2 : vector<1x24x32xbf16> to vector<24x32xbf16>
    %cst = arith.constant dense<0.000000e+00> : vector<320x32xf32>
    %4 = tpu.matmul %1, %3, %cst {dimension_numbers = #tpu.dot_dimension_numbers<[1], [0], [0], [1], [0, 0, 1, 1], [], []>} : vector<320x24xbf16>, vector<24x32xbf16>, vector<320x32xf32> -> vector<320x32xf32>
    %5 = vector.shape_cast %4 : vector<320x32xf32> to vector<2x160x32xf32>
    %6 = vector.extract_strided_slice %5 {offsets = [0, 0, 0], sizes = [2, 150, 32], strides = [1, 1, 1]} : vector<2x160x32xf32> to vector<2x150x32xf32>
    %c1 = arith.constant 1 : index
    %c0_5 = arith.constant 0 : index
    %c0_6 = arith.constant 0 : index
    %7 = vector.load %arg2[%c1, %c0_5, %c0_6] : memref<3x24x32xbf16, #tpu.memory_space<vmem>>, vector<1x24x32xbf16>
    %8 = vector.shape_cast %7 : vector<1x24x32xbf16> to vector<24x32xbf16>
    %cst_7 = arith.constant dense<0.000000e+00> : vector<320x32xf32>
    %9 = tpu.matmul %1, %8, %cst_7 {dimension_numbers = #tpu.dot_dimension_numbers<[1], [0], [0], [1], [0, 0, 1, 1], [], []>} : vector<320x24xbf16>, vector<24x32xbf16>, vector<320x32xf32> -> vector<320x32xf32>
    %10 = vector.shape_cast %9 : vector<320x32xf32> to vector<2x160x32xf32>
    %11 = vector.extract_strided_slice %10 {offsets = [0, 1, 0], sizes = [2, 150, 32], strides = [1, 1, 1]} : vector<2x160x32xf32> to vector<2x150x32xf32>
    %12 = arith.addf %6, %11 : vector<2x150x32xf32>
    %c2 = arith.constant 2 : index
    %c0_8 = arith.constant 0 : index
    %c0_9 = arith.constant 0 : index
    %13 = vector.load %arg2[%c2, %c0_8, %c0_9] : memref<3x24x32xbf16, #tpu.memory_space<vmem>>, vector<1x24x32xbf16>
    %14 = vector.shape_cast %13 : vector<1x24x32xbf16> to vector<24x32xbf16>
    %cst_10 = arith.constant dense<0.000000e+00> : vector<320x32xf32>
    %15 = tpu.matmul %1, %14, %cst_10 {dimension_numbers = #tpu.dot_dimension_numbers<[1], [0], [0], [1], [0, 0, 1, 1], [], []>} : vector<320x24xbf16>, vector<24x32xbf16>, vector<320x32xf32> -> vector<320x32xf32>
    %16 = vector.shape_cast %15 : vector<320x32xf32> to vector<2x160x32xf32>
    %17 = vector.extract_strided_slice %16 {offsets = [0, 2, 0], sizes = [2, 150, 32], strides = [1, 1, 1]} : vector<2x160x32xf32> to vector<2x150x32xf32>
    %18 = arith.addf %12, %17 : vector<2x150x32xf32>
    %c0_11 = arith.constant 0 : index
    %c0_12 = arith.constant 0 : index
    %19 = vector.load %arg3[%c0_11, %c0_12] : memref<150x32xf32, #tpu.memory_space<vmem>>, vector<150x32xf32>
    %20 = vector.shape_cast %19 : vector<150x32xf32> to vector<1x150x32xf32>
    %21 = vector.broadcast %20 : vector<1x150x32xf32> to vector<2x150x32xf32>
    %22 = arith.addf %18, %21 : vector<2x150x32xf32>
    %23 = arith.truncf %22 : vector<2x150x32xf32> to vector<2x150x32xbf16>
    %24 = vector.extract_strided_slice %23 {offsets = [0, 0, 0], sizes = [2, 148, 32], strides = [1, 1, 1]} : vector<2x150x32xbf16> to vector<2x148x32xbf16>
    %25 = vector.extract_strided_slice %23 {offsets = [0, 1, 0], sizes = [2, 148, 32], strides = [1, 1, 1]} : vector<2x150x32xbf16> to vector<2x148x32xbf16>
    %26 = arith.maximumf %24, %25 : vector<2x148x32xbf16>
    %27 = vector.extract_strided_slice %23 {offsets = [0, 2, 0], sizes = [2, 148, 32], strides = [1, 1, 1]} : vector<2x150x32xbf16> to vector<2x148x32xbf16>
    %28 = arith.maximumf %26, %27 : vector<2x148x32xbf16>
    %cst_13 = arith.constant 0.000000e+00 : bf16
    %29 = vector.broadcast %cst_13 : bf16 to vector<2x1x32xbf16>
    %cst_14 = arith.constant 0.000000e+00 : bf16
    %30 = vector.broadcast %cst_14 : bf16 to vector<2x11x32xbf16>
    %31 = tpu.concatenate %29, %28, %30 in 1 : vector<2x1x32xbf16>, vector<2x148x32xbf16>, vector<2x11x32xbf16> -> vector<2x160x32xbf16>
    %32 = vector.shape_cast %31 : vector<2x160x32xbf16> to vector<320x32xbf16>
    %c0_15 = arith.constant 0 : index
    %c0_16 = arith.constant 0 : index
    %c0_17 = arith.constant 0 : index
    %33 = vector.load %arg4[%c0_15, %c0_16, %c0_17] : memref<3x32x16xbf16, #tpu.memory_space<vmem>>, vector<1x32x16xbf16>
    %34 = vector.shape_cast %33 : vector<1x32x16xbf16> to vector<32x16xbf16>
    %cst_18 = arith.constant dense<0.000000e+00> : vector<320x16xf32>
    %35 = tpu.matmul %32, %34, %cst_18 {dimension_numbers = #tpu.dot_dimension_numbers<[1], [0], [0], [1], [0, 0, 1, 1], [], []>} : vector<320x32xbf16>, vector<32x16xbf16>, vector<320x16xf32> -> vector<320x16xf32>
    %36 = vector.shape_cast %35 : vector<320x16xf32> to vector<2x160x16xf32>
    %37 = vector.extract_strided_slice %36 {offsets = [0, 0, 0], sizes = [2, 148, 16], strides = [1, 1, 1]} : vector<2x160x16xf32> to vector<2x148x16xf32>
    %c1_19 = arith.constant 1 : index
    %c0_20 = arith.constant 0 : index
    %c0_21 = arith.constant 0 : index
    %38 = vector.load %arg4[%c1_19, %c0_20, %c0_21] : memref<3x32x16xbf16, #tpu.memory_space<vmem>>, vector<1x32x16xbf16>
    %39 = vector.shape_cast %38 : vector<1x32x16xbf16> to vector<32x16xbf16>
    %cst_22 = arith.constant dense<0.000000e+00> : vector<320x16xf32>
    %40 = tpu.matmul %32, %39, %cst_22 {dimension_numbers = #tpu.dot_dimension_numbers<[1], [0], [0], [1], [0, 0, 1, 1], [], []>} : vector<320x32xbf16>, vector<32x16xbf16>, vector<320x16xf32> -> vector<320x16xf32>
    %41 = vector.shape_cast %40 : vector<320x16xf32> to vector<2x160x16xf32>
    %42 = vector.extract_strided_slice %41 {offsets = [0, 1, 0], sizes = [2, 148, 16], strides = [1, 1, 1]} : vector<2x160x16xf32> to vector<2x148x16xf32>
    %43 = arith.addf %37, %42 : vector<2x148x16xf32>
    %c2_23 = arith.constant 2 : index
    %c0_24 = arith.constant 0 : index
    %c0_25 = arith.constant 0 : index
    %44 = vector.load %arg4[%c2_23, %c0_24, %c0_25] : memref<3x32x16xbf16, #tpu.memory_space<vmem>>, vector<1x32x16xbf16>
    %45 = vector.shape_cast %44 : vector<1x32x16xbf16> to vector<32x16xbf16>
    %cst_26 = arith.constant dense<0.000000e+00> : vector<320x16xf32>
    %46 = tpu.matmul %32, %45, %cst_26 {dimension_numbers = #tpu.dot_dimension_numbers<[1], [0], [0], [1], [0, 0, 1, 1], [], []>} : vector<320x32xbf16>, vector<32x16xbf16>, vector<320x16xf32> -> vector<320x16xf32>
    %47 = vector.shape_cast %46 : vector<320x16xf32> to vector<2x160x16xf32>
    %48 = vector.extract_strided_slice %47 {offsets = [0, 2, 0], sizes = [2, 148, 16], strides = [1, 1, 1]} : vector<2x160x16xf32> to vector<2x148x16xf32>
    %49 = arith.addf %43, %48 : vector<2x148x16xf32>
    %cst_27 = arith.constant dense<0xFF800000> : vector<2x16xf32>
    %50 = vector.multi_reduction <maximumf>, %49, %cst_27 [1] : vector<2x148x16xf32> to vector<2x16xf32>
    %c0_28 = arith.constant 0 : index
    %c0_29 = arith.constant 0 : index
    %51 = vector.load %arg5[%c0_28, %c0_29] : memref<1x16xf32, #tpu.memory_space<vmem>>, vector<1x16xf32>
    %52 = vector.broadcast %51 : vector<1x16xf32> to vector<2x16xf32>
    %53 = arith.addf %50, %52 : vector<2x16xf32>
    %c0_30 = arith.constant 0 : index
    %c0_31 = arith.constant 0 : index
    %54 = vector.load %arg6[%c0_30, %c0_31] : memref<2x16xf32, #tpu.memory_space<vmem>>, vector<2x16xf32>
    tpu.vector_store %arg6[%c0_30, %c0_31], %53 {strides = array<i32>} : memref<2x16xf32, #tpu.memory_space<vmem>>, vector<2x16xf32>,
    return
  }
  func.func @transform_0(%arg0: i32) -> (i32, i32, i32) {
    %c0_i32 = arith.constant 0 : i32
    %c0_i32_0 = arith.constant 0 : i32
    %c0_i32_1 = arith.constant 0 : i32
    return %arg0, %c0_i32, %c0_i32_0 : i32, i32, i32
  }
  func.func @transform_1(%arg0: i32) -> (i32, i32, i32) {
    %c0_i32 = arith.constant 0 : i32
    %c0_i32_0 = arith.constant 0 : i32
    %c0_i32_1 = arith.constant 0 : i32
    %c0_i32_2 = arith.constant 0 : i32
    return %c0_i32, %c0_i32_0, %c0_i32_1 : i32, i32, i32
  }
  func.func @transform_2(%arg0: i32) -> (i32, i32) {
    %c0_i32 = arith.constant 0 : i32
    %c0_i32_0 = arith.constant 0 : i32
    %c0_i32_1 = arith.constant 0 : i32
    return %c0_i32, %c0_i32_0 : i32, i32
  }
  func.func @transform_3(%arg0: i32) -> (i32, i32, i32) {
    %c0_i32 = arith.constant 0 : i32
    %c0_i32_0 = arith.constant 0 : i32
    %c0_i32_1 = arith.constant 0 : i32
    %c0_i32_2 = arith.constant 0 : i32
    return %c0_i32, %c0_i32_0, %c0_i32_1 : i32, i32, i32
  }
  func.func @transform_4(%arg0: i32) -> (i32, i32) {
    %c0_i32 = arith.constant 0 : i32
    %c0_i32_0 = arith.constant 0 : i32
    %c0_i32_1 = arith.constant 0 : i32
    return %c0_i32, %c0_i32_0 : i32, i32
  }
  func.func @transform_5(%arg0: i32) -> (i32, i32) {
    %c0_i32 = arith.constant 0 : i32
    %c0_i32_0 = arith.constant 0 : i32
    return %arg0, %c0_i32 : i32, i32
  }
}

</mosaic_0001>

<bundles_post_ra>
// kernel: tpu_custom_call.1
= control target key start
LH: loop header
LB: loop body
LE: loop exit
PB: predicated region body
PF: predicated region fallthrough
CT: control target
= control target key end

     0   :  { %vm235_vm0 = vcmask 1043456   ;;  %vm174_vm1 = vcmask 195584   ;;  %s4838_s0 = inlined_call_operand.vmem [shape: bf16[2,160,24], index: 0, kind: input, shape index: {}]   ;;  %s4839_s1 = inlined_call_operand.vmem [shape: bf16[3,24,32], index: 1, kind: input, shape index: {}]   ;;  %s4840_s2 = inlined_call_operand.vmem [shape: f32[150,32], index: 2, kind: input, shape index: {}]   ;;  %s4841_s3 = inlined_call_operand.vmem [shape: bf16[3,32,16], index: 3, kind: input, shape index: {}]   ;;  %s4842_s4 = inlined_call_operand.vmem [shape: f32[1,16], index: 4, kind: input, shape index: {}]   ;;  %s4843_s5 = inlined_call_operand.hbm [shape: f32[2,16], index: 5, kind: output, shape index: {}]  }
   0x1   :  { %v3515_v0 = vld [vmem:[%s4839_s1 + $0x8] ss:$0 sps:$4 sm:$0xff]   ;;  %v3517_v1 = vld [vmem:[%s4839_s1] sm:$0xff]   ;;  %v3516_v2 = vld [vmem:[%s4839_s1 + $0x14] ss:$0 sps:$4 sm:$0xff]  }
   0x2   :  { %3511 = vmatprep.subr.msk.bf16.mxu0 %vm235_vm0, %v3515_v0  ;;  %v237_v3 = vsel %vm235_vm0, %v3515_v0, 0  ;;  %v3518_v4 = vld [vmem:[%s4839_s1 + $0xc] sm:$0xff]   ;;  %3512 = vmatprep.subr.msk.bf16.mxu1 %vm235_vm0, %v3516_v2  ;;  %v444_v5 = vsel %vm235_vm0, %v3516_v2, 0  ;;  %v3619_v6 = vld [vmem:[%s4838_s0] sm:$0xff]   ;;  %v3523_v11 = vld [vmem:[%s4838_s0 + $0x18] sm:$0xff]  }
   0x3   :  { %3248 = vmatpush3.bf16.msra.mxu0 %v237_v3  ;;  %3292 = vmatpush3.bf16.msra.mxu1 %v444_v5  ;;  %v3521_v7 = vld [vmem:[%s4839_s1 + $0x20] ss:$0 sps:$4 sm:$0xff]   ;;  %v3631_v8 = vld [vmem:[%s4838_s0 + $0x8] sm:$0xff]   ;;  %v3638_v10 = vld [vmem:[%s4838_s0 + $0x10] sm:$0xff]  }
   0x4   :  { %3249 = vmatprep.subr.bf16.mxu0 %v3517_v1  ;;  %3293 = vmatprep.subr.bf16.mxu1 %v3518_v4  ;;  %v840_v9 = vsel %vm235_vm0, %v3521_v7, 0  ;;  %v3524_v12 = vld [vmem:[%s4838_s0 + $0x20] sm:$0xff]   ;;  %v3532_v13 = vld [vmem:[%s4839_s1 + $0x18] sm:$0xff]   ;;  %v3525_v14 = vld [vmem:[%s4838_s0 + $0x28] sm:$0xff]  }
   0x5   :  { %3251 = vmatprep.mubr.msk.bf16.mxu0 %vm174_vm1, %v3619_v6  ;;  %3295 = vmatprep.mubr.msk.bf16.mxu1 %vm174_vm1, %v3619_v6  ;;  %v3526_v15 = vld [vmem:[%s4838_s0 + $0x30] sm:$0xff]  }
   0x7   :  { %3250 = vmatpush3.bf16.msra.mxu0 %v3517_v1  ;;  %3294 = vmatpush3.bf16.msra.mxu1 %v3518_v4 }
   0x8   :  { %3513 = vmatprep.subr.msk.bf16.mxu0 %vm235_vm0, %v3521_v7 }
   0xa   :  { %3252 = vmatmul.mubr.msk.bf16.vlgmr.msra.gmra.mxu0 %vm174_vm1, %v3631_v8  ;;  %3296 = vmatmul.mubr.msk.bf16.vlgmr.msra.gmra.mxu1 %vm174_vm1, %v3631_v8 }
   0xb   :  { %3336 = vmatpush3.bf16.msra.mxu0 %v840_v9  ;;  %3255 = vmatprep.mubr.msk.bf16.mxu0 %vm174_vm1, %v3638_v10 }
   0xc   :  { %3299 = vmatprep.mubr.msk.bf16.mxu1 %vm174_vm1, %v3638_v10  ;;  %3337 = vmatprep.subr.bf16.mxu0 %v3532_v13 }
   0xf   :  { %3338 = vmatpush3.bf16.msra.mxu0 %v3532_v13 }
  0x12   :  { %3256 = vmatmul.mubr.msk.bf16.gmra.mxu0 %vm174_vm1, %v3523_v11  ;;  %3300 = vmatmul.mubr.msk.bf16.gmra.mxu1 %vm174_vm1, %v3523_v11 }
  0x13   :  { %3259 = vmatprep.mubr.msk.bf16.mxu0 %vm174_vm1, %v3524_v12  ;;  %3303 = vmatprep.mubr.msk.bf16.mxu1 %vm174_vm1, %v3524_v12 }
  0x1a   :  { %3260 = vmatmul.mubr.msk.bf16.gmra.mxu0 %vm174_vm1, %v3525_v14  ;;  %3304 = vmatmul.mubr.msk.bf16.gmra.mxu1 %vm174_vm1, %v3525_v14 }
  0x1b   :  { %3263 = vmatprep.mubr.msk.bf16.mxu0 %vm174_vm1, %v3526_v15  ;;  %3307 = vmatprep.mubr.msk.bf16.mxu1 %vm174_vm1, %v3526_v15 }
  0x1c   :  { %10 = vsyncpa [#allocation3], 0  ;;  %v3527_v16 = vld [vmem:[%s4838_s0 + $0x38] sm:$0xff]   ;;  %v3528_v17 = vld [vmem:[%s4838_s0 + $0x40] sm:$0xff]   ;;  %vm675_vm2 = vcmask 1046528   ;;  %vm1071_vm3 = vcmask 1045504  }
  0x1d   :  { %v3529_v18 = vld [vmem:[%s4838_s0 + $0x48] sm:$0xff]   ;;  %v3530_v19 = vld [vmem:[%s4838_s0 + $0x50] sm:$0xff]   ;;  %v3531_v20 = vld [vmem:[%s4838_s0 + $0x58] sm:$0xff]   ;;  %vm1299_vm4 = vsmask.f32 7424  ;;  %vm1760_vm6 = vcmask 1040384  }
  0x1e   :  { %v3533_v21 = vld [vmem:[%s4838_s0 + $0x60] sm:$0xff]   ;;  %v3534_v22 = vld [vmem:[%s4838_s0 + $0x68] sm:$0xff]   ;;  %v3535_v23 = vld [vmem:[%s4838_s0 + $0x70] sm:$0xff]   ;;  %vm1597_vm5 = vsmask.f32 256  ;;  %vm1785_vm7 = vcmask 261120  }
  0x1f   :  { %v3536_v24 = vld [vmem:[%s4838_s0 + $0x78] sm:$0xff]   ;;  %v3537_v25 = vld [vmem:[%s4838_s0 + $0x80] sm:$0xff]   ;;  %v3538_v26 = vld [vmem:[%s4838_s0 + $0x88] sm:$0xff]   ;;  %vm1764_vm9 = vcmask 1042432   ;;  %vm1765_vm10 = vsmask.f32 2304 }
  0x20   :  { %v3539_v27 = vld [vmem:[%s4838_s0 + $0x90] sm:$0xff]   ;;  %v3540_v28 = vld [vmem:[%s4838_s0 + $0x98] sm:$0xff]   ;;  %v3541_v29 = vld [vmem:[%s4841_s3 + $0x8] sm:$0xff]   ;;  %vm2829_vm12 = vcmask 130048   ;;  %vm2864_vm13 = vcmask 125952   ;;  %s3569_s15 = smov [#allocation2]  }
  0x21   :  { %3379 = vmatprep.subr.bf16.mxu1 %v3541_v29  ;;  %v3542_v30 = vld [vmem:[%s4841_s3] sm:$0xff]   ;;  %v3543_v31 = vld [vmem:[%s4841_s3 + $0x18] sm:$0xff]   ;;  %v3544_v32 = vld [vmem:[%s4841_s3 + $0x10] sm:$0xff]   ;;  %s2940_s16 = sshll.u32 %s3569_s15, 4  ;;  %vm2929_vm14 = vcmask 1041409   ;;  %vm2932_vm15 = vcmask 123904   ;;  %s2941_s16 = int_to_ptr.vmem [resolvable:$true] %s2940_s16 }
  0x22   :  { %3264 = vmatmul.mubr.msk.bf16.gmra.mxu0 %vm174_vm1, %v3527_v16  ;;  %3308 = vmatmul.mubr.msk.bf16.gmra.mxu1 %vm174_vm1, %v3527_v16  ;;  %v3776_v36 = vld [vmem:[%s4841_s3 + $0x28] sm:$0xff]   ;;  %vm4083_vm8 = vmand %vm1760_vm6, %vm1597_vm5  ;;  %s3547_s17 = scalar_lea.vmem %s2941_s16, 32  ;;  %p3552_p1 = scmp.lt.s32.totalorder %s2941_s16, %s2941_s16 }
  0x23   :  { %3267 = vmatprep.mubr.msk.bf16.mxu0 %vm174_vm1, %v3528_v17  ;;  %3311 = vmatprep.mubr.msk.bf16.mxu1 %vm174_vm1, %v3528_v17  ;;  %vm4411_vm11 = vmand %vm1764_vm9, %vm1765_vm10  ;;  %p3548_p0 = scmp.ne.s32.totalorder %s2941_s16, %s3547_s17  ;;  %p3553_p2 = scmp.lt.s32.totalorder %s3547_s17, %s3547_s17 }
  0x24   :  { %3380 = vmatpush3.bf16.msra.mxu1 %v3541_v29  ;;  %3423 = vmatprep.subr.bf16.mxu0 %v3543_v31 }
  0x25   :  { %3381 = vmatprep.subr.bf16.mxu1 %v3542_v30  ;;  %p3554_p3 = por %p3553_p2, %p3552_p1 }
  0x27   :  { %p3555_p4 = pnand %p3554_p3, %p3548_p0 }
  0x28   :  { %3382 = vmatpush3.bf16.msra.mxu1 %v3542_v30 }
  0x29   :  { %3467 = vmatprep.subr.bf16.mxu1 %v3776_v36 }
  0x2a   :  { %3268 = vmatmul.mubr.msk.bf16.gmra.mxu0 %vm174_vm1, %v3529_v18  ;;  %3312 = vmatmul.mubr.msk.bf16.gmra.mxu1 %vm174_vm1, %v3529_v18 }
  0x2b   :  { %3271 = vmatprep.mubr.msk.bf16.mxu0 %vm174_vm1, %v3530_v19  ;;  %3315 = vmatprep.mubr.msk.bf16.mxu1 %vm174_vm1, %v3530_v19 }
  0x32   :  { %3272 = vmatmul.mubr.msk.bf16.gmra.mxu0 %vm174_vm1, %v3531_v20  ;;  %3316 = vmatmul.mubr.msk.bf16.gmra.mxu1 %vm174_vm1, %v3531_v20 }
  0x33   :  { %3275 = vmatprep.mubr.msk.bf16.mxu0 %vm174_vm1, %v3533_v21  ;;  %3319 = vmatprep.mubr.msk.bf16.mxu1 %vm174_vm1, %v3533_v21 }
  0x3a   :  { %3276 = vmatmul.mubr.msk.bf16.gmra.mxu0 %vm174_vm1, %v3534_v22  ;;  %3320 = vmatmul.mubr.msk.bf16.gmra.mxu1 %vm174_vm1, %v3534_v22 }
  0x3b   :  { %3279 = vmatprep.mubr.msk.bf16.mxu0 %vm174_vm1, %v3535_v23  ;;  %3323 = vmatprep.mubr.msk.bf16.mxu1 %vm174_vm1, %v3535_v23 }
  0x42   :  { %3280 = vmatmul.mubr.msk.bf16.gmra.mxu0 %vm174_vm1, %v3536_v24  ;;  %3324 = vmatmul.mubr.msk.bf16.gmra.mxu1 %vm174_vm1, %v3536_v24 }
  0x43   :  { %3283 = vmatprep.mubr.msk.bf16.mxu0 %vm174_vm1, %v3537_v25  ;;  %3327 = vmatprep.mubr.msk.bf16.mxu1 %vm174_vm1, %v3537_v25 }
  0x4a   :  { %3284 = vmatmul.mubr.msk.bf16.gmra.mxu0 %vm174_vm1, %v3538_v26  ;;  %3328 = vmatmul.mubr.msk.bf16.gmra.mxu1 %vm174_vm1, %v3538_v26 }
  0x4b   :  { %3287 = vmatprep.mubr.msk.bf16.mxu0 %vm174_vm1, %v3539_v27  ;;  %3331 = vmatprep.mubr.msk.bf16.mxu1 %vm174_vm1, %v3539_v27 }
  0x52   :  { %3288 = vmatmul.mubr.msk.bf16.gmra.mxu0 %vm174_vm1, %v3540_v28  ;;  %3332 = vmatmul.mubr.msk.bf16.gmra.mxu1 %vm174_vm1, %v3540_v28 }
  0x53   :  { %3339 = vmatprep.mubr.msk.bf16.mxu0 %vm174_vm1, %v3619_v6 }
  0x5a   :  { %3340 = vmatmul.mubr.msk.bf16.vlgmr.msra.gmra.mxu0 %vm174_vm1, %v3631_v8 }
  0x5b   :  { %3343 = vmatprep.mubr.msk.bf16.mxu0 %vm174_vm1, %v3638_v10  ;;  %3424 = vmatpush3.bf16.msra.mxu0 %v3543_v31 }
  0x5c   :  { %3425 = vmatprep.subr.bf16.mxu0 %v3544_v32 }
  0x5f   :  { %3426 = vmatpush3.bf16.msra.mxu0 %v3544_v32 }
  0x62   :  { %3344 = vmatmul.mubr.msk.bf16.gmra.mxu0 %vm174_vm1, %v3523_v11 }
  0x63   :  { %3347 = vmatprep.mubr.msk.bf16.mxu0 %vm174_vm1, %v3524_v12 }
  0x6a   :  { %3348 = vmatmul.mubr.msk.bf16.gmra.mxu0 %vm174_vm1, %v3525_v14 }
  0x6b   :  { %3351 = vmatprep.mubr.msk.bf16.mxu0 %vm174_vm1, %v3526_v15 }
  0x72   :  { %3352 = vmatmul.mubr.msk.bf16.gmra.mxu0 %vm174_vm1, %v3527_v16 }
  0x73   :  { %3355 = vmatprep.mubr.msk.bf16.mxu0 %vm174_vm1, %v3528_v17 }
  0x7a   :  { %3356 = vmatmul.mubr.msk.bf16.gmra.mxu0 %vm174_vm1, %v3529_v18 }
  0x7b   :  { %3359 = vmatprep.mubr.msk.bf16.mxu0 %vm174_vm1, %v3530_v19 }
  0x82   :  { %3360 = vmatmul.mubr.msk.bf16.gmra.mxu0 %vm174_vm1, %v3531_v20 }
  0x83   :  { %3363 = vmatprep.mubr.msk.bf16.mxu0 %vm174_vm1, %v3533_v21 }
  0x8a   :  { %3364 = vmatmul.mubr.msk.bf16.gmra.mxu0 %vm174_vm1, %v3534_v22 }
  0x8b   :  { %3367 = vmatprep.mubr.msk.bf16.mxu0 %vm174_vm1, %v3535_v23 }
  0x92   :  { %3368 = vmatmul.mubr.msk.bf16.gmra.mxu0 %vm174_vm1, %v3536_v24 }
  0x93   :  { %3371 = vmatprep.mubr.msk.bf16.mxu0 %vm174_vm1, %v3537_v25 }
  0x9a   :  { %3372 = vmatmul.mubr.msk.bf16.gmra.mxu0 %vm174_vm1, %v3538_v26 }
  0x9b   :  { %3375 = vmatprep.mubr.msk.bf16.mxu0 %vm174_vm1, %v3539_v27 }
  0xa2   :  { %3376 = vmatmul.mubr.msk.bf16.gmra.mxu0 %vm174_vm1, %v3540_v28 }
  0xca   :  { %v3253_v33 = vpop.f32.mrf.mxu0  ;;  %v3771_v34 = vpop.f32.mrf.mxu1 }
  0xcb   :  { %v679_v38 = vrot.slane %v3771_v34, 1  ;;  %v3919_v34 = vld [vmem:[%s4840_s2] sm:$0xff] }
  0xcc   :  { %v273_v35 = vpop.f32.mrf.mxu0  ;;  %v480_v37 = vpop.f32.mrf.mxu1 }
  0xcd   :  { %v676_v41 = vrot.slane %v480_v37, 1 }
  0xce   :  { %v3254_v39 = vpop.f32.mrf.mxu0  ;;  %v3298_v40 = vpop.f32.mrf.mxu1 }
  0xcf   :  { %v681_v42 = vrot.slane %v3298_v40, 1 }
  0xd0   :  { %v3780_v43 = vpop.f32.mrf.mxu0  ;;  %v3782_v44 = vpop.f32.mrf.mxu1 }
  0xd1   :  { %v682_v45 = vsel %vm675_vm2, %v679_v38, %v681_v42  ;;  %v677_v46 = vrot.slane %v3782_v44, 1 }
  0xd2   :  { %v3257_v47 = vpop.f32.mrf.mxu0  ;;  %v3788_v48 = vadd.f32 %v3253_v33, %v682_v45  ;;  %v3790_v49 = vpop.f32.mrf.mxu1 }
  0xd3   :  { %v678_v50 = vsel %vm675_vm2, %v676_v41, %v677_v46  ;;  %v687_v54 = vrot.slane %v3790_v49, 1 }
  0xd4   :  { %v289_v51 = vpop.f32.mrf.mxu0  ;;  %v3795_v52 = vadd.f32 %v678_v50, %v273_v35  ;;  %v496_v53 = vpop.f32.mrf.mxu1 }
  0xd5   :  { %v683_v55 = vrot.slane %v496_v53, 1 }
  0xd6   :  { %v3258_v56 = vpop.f32.mrf.mxu0  ;;  %v3302_v57 = vpop.f32.mrf.mxu1 }
  0xd7   :  { %v684_v58 = vsel %vm675_vm2, %v681_v42, %v683_v55  ;;  %v689_v59 = vrot.slane %v3302_v57, 1 }
  0xd8   :  { %v3799_v60 = vpop.f32.mrf.mxu0  ;;  %v3801_v61 = vadd.f32 %v3254_v39, %v684_v58  ;;  %v3803_v62 = vpop.f32.mrf.mxu1 }
  0xd9   :  { %v690_v63 = vsel %vm675_vm2, %v687_v54, %v689_v59  ;;  %v4844_v0 = vrot.slane %v3803_v62, 1 }
  0xda   :  { %v3261_v1 = vpop.f32.mrf.mxu0  ;;  %v3809_v2 = vadd.f32 %v3257_v47, %v690_v63  ;;  %v3305_v3 = vpop.f32.mrf.mxu1 }
  0xdb   :  { %v686_v4 = vsel %vm675_vm2, %v683_v55, %v4844_v0  ;;  %v695_v8 = vrot.slane %v3305_v3, 1 }
  0xdc   :  { %v305_v5 = vpop.f32.mrf.mxu0  ;;  %v3814_v6 = vadd.f32 %v686_v4, %v289_v51  ;;  %v512_v7 = vpop.f32.mrf.mxu1 }
  0xdd   :  { %v691_v9 = vrot.slane %v512_v7, 1 }
  0xde   :  { %v3262_v10 = vpop.f32.mrf.mxu0  ;;  %v3306_v11 = vpop.f32.mrf.mxu1 }
  0xdf   :  { %v692_v12 = vsel %vm675_vm2, %v689_v59, %v691_v9  ;;  %v697_v13 = vrot.slane %v3306_v11, 1 }
  0xe0   :  { %v308_v14 = vpop.f32.mrf.mxu0  ;;  %v3817_v15 = vadd.f32 %v3258_v56, %v692_v12  ;;  %v515_v16 = vpop.f32.mrf.mxu1 }
  0xe1   :  { %v698_v17 = vsel %vm675_vm2, %v695_v8, %v697_v13  ;;  %v693_v18 = vrot.slane %v515_v16, 1 }
  0xe2   :  { %v3265_v19 = vpop.f32.mrf.mxu0  ;;  %v3820_v20 = vadd.f32 %v3261_v1, %v698_v17  ;;  %v3309_v21 = vpop.f32.mrf.mxu1 }
  0xe3   :  { %v694_v22 = vsel %vm675_vm2, %v691_v9, %v693_v18  ;;  %v696_v23 = vsel %vm675_vm2, %v693_v18, %v695_v8  ;;  %v703_v28 = vrot.slane %v3309_v21, 1 }
  0xe4   :  { %v321_v24 = vpop.f32.mrf.mxu0  ;;  %v3824_v25 = vadd.f32 %v694_v22, %v305_v5  ;;  %v3826_v26 = vadd.f32 %v696_v23, %v308_v14  ;;  %v528_v27 = vpop.f32.mrf.mxu1 }
  0xe5   :  { %v699_v29 = vrot.slane %v528_v27, 1 }
  0xe6   :  { %v3266_v30 = vpop.f32.mrf.mxu0  ;;  %v3310_v31 = vpop.f32.mrf.mxu1 }
  0xe7   :  { %v700_v32 = vsel %vm675_vm2, %v697_v13, %v699_v29  ;;  %v705_v33 = vrot.slane %v3310_v31, 1 }
  0xe8   :  { %v324_v35 = vpop.f32.mrf.mxu0  ;;  %v3829_v37 = vadd.f32 %v3262_v10, %v700_v32  ;;  %v531_v39 = vpop.f32.mrf.mxu1 }
  0xe9   :  { %v706_v40 = vsel %vm675_vm2, %v703_v28, %v705_v33  ;;  %v701_v41 = vrot.slane %v531_v39, 1 }
  0xea   :  { %v3269_v42 = vpop.f32.mrf.mxu0  ;;  %v3832_v45 = vadd.f32 %v3265_v19, %v706_v40  ;;  %v3313_v47 = vpop.f32.mrf.mxu1 }
  0xeb   :  { %v702_v50 = vsel %vm675_vm2, %v699_v29, %v701_v41  ;;  %v704_v51 = vsel %vm675_vm2, %v701_v41, %v703_v28  ;;  %v711_v53 = vrot.slane %v3313_v47, 1 }
  0xec   :  { %v337_v55 = vpop.f32.mrf.mxu0  ;;  %v3836_v56 = vadd.f32 %v702_v50, %v321_v24  ;;  %v3838_v57 = vadd.f32 %v704_v51, %v324_v35  ;;  %v544_v58 = vpop.f32.mrf.mxu1 }
  0xed   :  { %v3840_v59 = vadd.f32 %v3269_v42, %v711_v53  ;;  %v707_v63 = vrot.slane %v544_v58, 1 }
  0xee   :  { %v3270_v1 = vpop.f32.mrf.mxu0  ;;  %v3314_v3 = vpop.f32.mrf.mxu1 }
  0xef   :  { %v708_v4 = vsel %vm675_vm2, %v705_v33, %v707_v63 }
  0xf0   :  { %v340_v5 = vpop.f32.mrf.mxu0  ;;  %v3843_v7 = vadd.f32 %v3266_v30, %v708_v4  ;;  %v547_v8 = vpop.f32.mrf.mxu1 }
  0xf1   :  { %v709_v9 = vrot.slane %v547_v8, 1 }
  0xf2   :  { %v3273_v10 = vpop.f32.mrf.mxu0  ;;  %v3317_v11 = vpop.f32.mrf.mxu1 }
  0xf3   :  { %v710_v12 = vsel %vm675_vm2, %v707_v63, %v709_v9  ;;  %v712_v13 = vsel %vm675_vm2, %v709_v9, %v711_v53  ;;  %v716_v19 = vrot.slane %v3317_v11, 1 }
  0xf4   :  { %v352_v14 = vpop.f32.mrf.mxu0  ;;  %v3847_v16 = vadd.f32 %v710_v12, %v337_v55  ;;  %v3849_v17 = vadd.f32 %v712_v13, %v340_v5  ;;  %v559_v18 = vpop.f32.mrf.mxu1 }
  0xf5   :  { %v713_v23 = vrot.slane %v559_v18, 1 }
  0xf6   :  { %v3274_v21 = vpop.f32.mrf.mxu0  ;;  %v3318_v22 = vpop.f32.mrf.mxu1 }
  0xf7   :  { %v718_v24 = vrot.slane %v3318_v22, 1 }
  0xf8   :  { %v355_v27 = vpop.f32.mrf.mxu0  ;;  %v562_v28 = vpop.f32.mrf.mxu1 }
  0xf9   :  { %v719_v29 = vsel %vm675_vm2, %v716_v19, %v718_v24  ;;  %v714_v30 = vrot.slane %v562_v28, 1 }
  0xfa   :  { %v3277_v31 = vpop.f32.mrf.mxu0  ;;  %v3852_v32 = vadd.f32 %v3273_v10, %v719_v29  ;;  %v3321_v33 = vpop.f32.mrf.mxu1 }
  0xfb   :  { %v715_v35 = vsel %vm675_vm2, %v713_v23, %v714_v30  ;;  %v717_v39 = vsel %vm675_vm2, %v714_v30, %v716_v19  ;;  %v724_v50 = vrot.slane %v3321_v33, 1 }
  0xfc   :  { %v368_v40 = vpop.f32.mrf.mxu0  ;;  %v3856_v41 = vadd.f32 %v715_v35, %v352_v14  ;;  %v3858_v42 = vadd.f32 %v717_v39, %v355_v27  ;;  %v575_v47 = vpop.f32.mrf.mxu1 }
  0xfd   :  { %v720_v51 = vrot.slane %v575_v47, 1 }
  0xfe   :  { %v3278_v53 = vpop.f32.mrf.mxu0  ;;  %v3322_v55 = vpop.f32.mrf.mxu1 }
  0xff   :  { %v721_v58 = vsel %vm675_vm2, %v718_v24, %v720_v51  ;;  %v726_v63 = vrot.slane %v3322_v55, 1 }
 0x100   :  { %v371_v1 = vpop.f32.mrf.mxu0  ;;  %v3861_v3 = vadd.f32 %v3274_v21, %v721_v58  ;;  %v578_v4 = vpop.f32.mrf.mxu1 }
 0x101   :  { %v727_v5 = vsel %vm675_vm2, %v724_v50, %v726_v63  ;;  %v722_v8 = vrot.slane %v578_v4, 1 }
 0x102   :  { %v3281_v9 = vpop.f32.mrf.mxu0  ;;  %v3864_v10 = vadd.f32 %v3277_v31, %v727_v5  ;;  %v3325_v11 = vpop.f32.mrf.mxu1 }
 0x103   :  { %v723_v12 = vsel %vm675_vm2, %v720_v51, %v722_v8  ;;  %v725_v13 = vsel %vm675_vm2, %v722_v8, %v724_v50  ;;  %v732_v21 = vrot.slane %v3325_v11, 1 }
 0x104   :  { %v384_v14 = vpop.f32.mrf.mxu0  ;;  %v3868_v18 = vadd.f32 %v723_v12, %v368_v40  ;;  %v3870_v19 = vadd.f32 %v725_v13, %v371_v1  ;;  %v591_v22 = vpop.f32.mrf.mxu1 }
 0x105   :  { %v728_v23 = vrot.slane %v591_v22, 1 }
 0x106   :  { %v3282_v24 = vpop.f32.mrf.mxu0  ;;  %v3326_v27 = vpop.f32.mrf.mxu1 }
 0x107   :  { %v729_v28 = vsel %vm675_vm2, %v726_v63, %v728_v23  ;;  %v734_v29 = vrot.slane %v3326_v27, 1 }
 0x108   :  { %v387_v30 = vpop.f32.mrf.mxu0  ;;  %v3873_v31 = vadd.f32 %v3278_v53, %v729_v28  ;;  %v594_v33 = vpop.f32.mrf.mxu1 }
 0x109   :  { %v735_v35 = vsel %vm675_vm2, %v732_v21, %v734_v29  ;;  %v730_v39 = vrot.slane %v594_v33, 1 }
 0x10a   :  { %v3285_v47 = vpop.f32.mrf.mxu0  ;;  %v3876_v40 = vadd.f32 %v3281_v9, %v735_v35  ;;  %v3329_v50 = vpop.f32.mrf.mxu1 }
 0x10b   :  { %v731_v51 = vsel %vm675_vm2, %v728_v23, %v730_v39  ;;  %v733_v55 = vsel %vm675_vm2, %v730_v39, %v732_v21  ;;  %v740_v53 = vrot.slane %v3329_v50, 1 }
 0x10c   :  { %v400_v58 = vpop.f32.mrf.mxu0  ;;  %v3880_v1 = vadd.f32 %v731_v51, %v384_v14  ;;  %v3882_v63 = vadd.f32 %v733_v55, %v387_v30  ;;  %v607_v4 = vpop.f32.mrf.mxu1 }
 0x10d   :  { %v736_v5 = vrot.slane %v607_v4, 1 }
 0x10e   :  { %v3286_v8 = vpop.f32.mrf.mxu0  ;;  %v3330_v11 = vpop.f32.mrf.mxu1 }
 0x10f   :  { %v737_v12 = vsel %vm675_vm2, %v734_v29, %v736_v5  ;;  %v742_v13 = vrot.slane %v3330_v11, 1 }
 0x110   :  { %v403_v9 = vpop.f32.mrf.mxu0  ;;  %v3885_v22 = vadd.f32 %v3282_v24, %v737_v12  ;;  %v610_v27 = vpop.f32.mrf.mxu1 }
 0x111   :  { %v743_v23 = vsel %vm675_vm2, %v740_v53, %v742_v13  ;;  %v738_v21 = vrot.slane %v610_v27, 1 }
 0x112   :  { %v3289_v28 = vpop.f32.mrf.mxu0  ;;  %v3888_v14 = vadd.f32 %v3285_v47, %v743_v23  ;;  %v3333_v30 = vpop.f32.mrf.mxu1 }
 0x113   :  { %v739_v33 = vsel %vm675_vm2, %v736_v5, %v738_v21  ;;  %v741_v35 = vsel %vm675_vm2, %v738_v21, %v740_v53  ;;  %v748_v39 = vrot.slane %v3333_v30, 1 }
 0x114   :  { %v416_v50 = vpop.f32.mrf.mxu0  ;;  %v3892_v51 = vadd.f32 %v739_v33, %v400_v58  ;;  %v3894_v29 = vadd.f32 %v741_v35, %v403_v9  ;;  %v623_v24 = vpop.f32.mrf.mxu1 }
 0x115   :  { %v3896_v55 = vadd.f32 %v3289_v28, %v748_v39  ;;  %v744_v4 = vrot.slane %v623_v24, 1 }
 0x116   :  { %4853 = vst [vmem:[#allocation5_spill] sm:$0xff] %v3892_v51  ;;  %4854 = vst [vmem:[#allocation6_spill] sm:$0xff] %v3894_v29  ;;  %v3290_v11 = vpop.f32.mrf.mxu0  ;;  %v3334_v12 = vpop.f32.mrf.mxu1 }
 0x117   :  { %4855 = vst [vmem:[#allocation7_spill] sm:$0xff] %v3896_v55  ;;  %v745_v47 = vsel %vm675_vm2, %v742_v13, %v744_v4 }
 0x118   :  { %v419_v27 = vpop.f32.mrf.mxu0  ;;  %v3899_v23 = vadd.f32 %v3286_v8, %v745_v47  ;;  %v626_v5 = vpop.f32.mrf.mxu1  ;;  %v680_v8 = vsel %vm675_vm2, %v677_v46, %v679_v38  ;;  %v3924_v38 = vld [vmem:[%s4840_s2 + $0x8] sm:$0xff] }
 0x119   :  { %v746_v0 = vrot.slane %v626_v5, 1 }
 0x11a   :  { %4856 = vst [vmem:[#allocation8_spill] sm:$0xff] %v3899_v23  ;;  %v3341_v53 = vpop.f32.mrf.mxu0 }
 0x11b   :  { %v747_v21 = vsel %vm675_vm2, %v744_v4, %v746_v0  ;;  %v749_v58 = vsel %vm675_vm2, %v746_v0, %v748_v39  ;;  %v1075_v24 = vrot.slane %v3341_v53, 2  ;;  %v789_v0 = vadd.f32 %v680_v8, %v3780_v43 }
 0x11c   :  { %v876_v9 = vpop.f32.mrf.mxu0  ;;  %v3903_v30 = vadd.f32 %v747_v21, %v416_v50  ;;  %v3905_v28 = vadd.f32 %v749_v58, %v419_v27 }
 0x11d   :  { %v1072_v11 = vrot.slane %v876_v9, 2  ;;  %v3933_v9 = vld [vmem:[%s4840_s2 + $0x10] sm:$0xff] }
 0x11e   :  { %4857 = vst [vmem:[#allocation9_spill] sm:$0xff] %v3903_v30  ;;  %4858 = vst [vmem:[#allocation10_spill] sm:$0xff] %v3905_v28  ;;  %v3342_v33 = vpop.f32.mrf.mxu0 }
 0x11f   :  { %v1077_v13 = vrot.slane %v3342_v33, 2 }
 0x120   :  { %v879_v35 = vpop.f32.mrf.mxu0 }
 0x121   :  { %v1073_v4 = vrot.slane %v879_v35, 2  ;;  %v1078_v50 = vsel %vm1071_vm3, %v1075_v24, %v1077_v13 }
 0x122   :  { %v3345_v39 = vpop.f32.mrf.mxu0  ;;  %v1186_v5 = vadd.f32 %v1078_v50, %v3788_v48  ;;  %v4859_v48 = vrot.slane %v3803_v62, 1 }
 0x123   :  { %v1074_v12 = vsel %vm1071_vm3, %v1072_v11, %v1073_v4  ;;  %v1076_v47 = vsel %vm1071_vm3, %v1073_v4, %v1075_v24  ;;  %v1083_v33 = vrot.slane %v3345_v39, 2 }
 0x124   :  { %v1184_v44 = vadd.f32 %v1074_v12, %v3795_v52  ;;  %v1185_v43 = vadd.f32 %v1076_v47, %v789_v0  ;;  %v892_v46 = vpop.f32.mrf.mxu0  ;;  %v3939_v52 = vld [vmem:[%s4840_s2 + $0x18] sm:$0xff]  ;;  %v688_v24 = vsel %vm675_vm2, %v4859_v48, %v687_v54  ;;  %v1243_v50 = vadd.f32 %v3933_v9, %v1186_v5  ;;  %v3958_v54 = vld [vmem:[%s4840_s2 + $0x30] sm:$0xff] }
 0x125   :  { %v1079_v27 = vrot.slane %v892_v46, 2  ;;  %v793_v62 = vadd.f32 %v688_v24, %v3799_v60  ;;  %v3965_v46 = vld [vmem:[%s4840_s2 + $0x20] sm:$0xff]  ;;  %v3973_v60 = vld [vmem:[%s4840_s2 + $0x28] sm:$0xff] }
 0x126   :  { %v1241_v53 = vadd.f32 %v3919_v34, %v1184_v44  ;;  %v1242_v21 = vadd.f32 %v3924_v38, %v1185_v43  ;;  %v3346_v58 = vpop.f32.mrf.mxu0 }
 0x127   :  { %v1080_v8 = vsel %vm1071_vm3, %v1077_v13, %v1079_v27  ;;  %v1085_v35 = vrot.slane %v3346_v58, 2 }
 0x128   :  { %v3946_v11 = vpack.c.bf16 %v1242_v21, %v1241_v53  ;;  %v1187_v4 = vadd.f32 %v1080_v8, %v3801_v61  ;;  %v895_v0 = vpop.f32.mrf.mxu0 }
 0x129   :  { %v1086_v39 = vsel %vm1071_vm3, %v1083_v33, %v1085_v35  ;;  %v1081_v13 = vrot.slane %v895_v0, 2 }
 0x12a   :  { %v1303_v12 = vshll.u32 %v3946_v11, 16  ;;  %v1244_v47 = vadd.f32 %v3939_v52, %v1187_v4  ;;  %v1190_v49 = vadd.f32 %v1086_v39, %v3809_v2  ;;  %v3349_v44 = vpop.f32.mrf.mxu0 }
 0x12b   :  { %v1082_v61 = vsel %vm1071_vm3, %v1079_v27, %v1081_v13  ;;  %v1084_v43 = vsel %vm1071_vm3, %v1081_v13, %v1083_v33  ;;  %v1301_v27 = vshrl.u32 %v3946_v11, 16  ;;  %v1091_v33 = vrot.slane %v3349_v44, 2 }
 0x12c   :  { %v1305_v5 = vrot.slane %v1303_v12, 1  ;;  %v3967_v53 = vpack.c.bf16 %v1244_v47, %v1243_v50  ;;  %v1188_v2 = vadd.f32 %v1082_v61, %v3814_v6  ;;  %v908_v21 = vpop.f32.mrf.mxu0  ;;  %v1189_v58 = vadd.f32 %v1084_v43, %v793_v62  ;;  %v3985_v50 = vld [vmem:[%s4840_s2 + $0x38] sm:$0xff] }
 0x12d   :  { %v1087_v8 = vrot.slane %v908_v21, 2  ;;  %v1247_v48 = vadd.f32 %v3958_v54, %v1190_v49  ;;  %v1519_v6 = vrot.slane %v3946_v11, 1 }
 0x12e   :  { %v1245_v24 = vadd.f32 %v3965_v46, %v1188_v2  ;;  %v3350_v4 = vpop.f32.mrf.mxu0  ;;  %v1308_v0 = vshll.u32 %v3967_v53, 16  ;;  %v1246_v39 = vadd.f32 %v3973_v60, %v1189_v58  ;;  %v1520_v47 = vrot.slane %v3967_v53, 1 }
 0x12f   :  { %v1088_v13 = vsel %vm1071_vm3, %v1085_v35, %v1087_v8  ;;  %v1093_v12 = vrot.slane %v3350_v4, 2  ;;  %v1312_v49 = vshrl.u32 %v3967_v53, 16  ;;  %v1306_v61 = vor.u32 %v1305_v5, %v1301_v27  ;;  %v3996_v35 = vld [vmem:[%s4840_s2 + $0x50] sm:$0xff] }
 0x130   :  { %v1191_v44 = vadd.f32 %v1088_v13, %v3817_v15  ;;  %v911_v62 = vpop.f32.mrf.mxu0  ;;  %v1310_v43 = vrot.slane %v1308_v0, 1  ;;  %v3990_v2 = vpack.c.bf16 %v1246_v39, %v1245_v24  ;;  %v1521_v4 = vsel %vm675_vm2, %v1519_v6, %v1520_v47  ;;  %v4009_v6 = vld [vmem:[%s4840_s2 + $0x40] sm:$0xff] }
 0x131   :  { %v1094_v21 = vsel %vm1071_vm3, %v1091_v33, %v1093_v12  ;;  %v1089_v58 = vrot.slane %v911_v62, 2 }
 0x132   :  { %v1248_v28 = vadd.f32 %v3985_v50, %v1191_v44  ;;  %v1194_v30 = vadd.f32 %v1094_v21, %v3820_v20  ;;  %v3353_v15 = vpop.f32.mrf.mxu0  ;;  %v1311_v5 = vsel %vm1299_vm4, %v1306_v61, %v1310_v43  ;;  %v1314_v27 = vor.u32 %v1312_v49, %v1310_v43  ;;  %v4019_v61 = vld [vmem:[%s4840_s2 + $0x48] sm:$0xff] }
 0x133   :  { %v1316_v24 = vshll.u32 %v3990_v2, 16  ;;  %v1090_v13 = vsel %vm1071_vm3, %v1087_v8, %v1089_v58  ;;  %v1092_v49 = vsel %vm1071_vm3, %v1089_v58, %v1091_v33  ;;  %v1099_v0 = vrot.slane %v3353_v15, 2 }
 0x134   :  { %v4011_v20 = vpack.c.bf16 %v1248_v28, %v1247_v48  ;;  %v1251_v44 = vadd.f32 %v3996_v35, %v1194_v30  ;;  %v1192_v62 = vadd.f32 %v1090_v13, %v3824_v25  ;;  %v924_v8 = vpop.f32.mrf.mxu0  ;;  %v1193_v21 = vadd.f32 %v1092_v49, %v3826_v26 }
 0x135   :  { %v1318_v43 = vrot.slane %v1316_v24, 1  ;;  %v1095_v39 = vrot.slane %v924_v8, 2  ;;  %v1478_v25 = vmax.bf16 %v1311_v5, %v3946_v11  ;;  %v4031_v24 = vld [vmem:[%s4840_s2 + $0x58] sm:$0xff] }
 0x136   :  { %v1324_v28 = vshll.u32 %v4011_v20, 16  ;;  %v1249_v30 = vadd.f32 %v4009_v6, %v1192_v62  ;;  %v3354_v33 = vpop.f32.mrf.mxu0  ;;  %v1250_v58 = vadd.f32 %v4019_v61, %v1193_v21  ;;  %v4044_v21 = vld [vmem:[%s4840_s2 + $0x70] sm:$0xff] }
 0x137   :  { %v1096_v13 = vsel %vm1071_vm3, %v1093_v12, %v1095_v39  ;;  %v1101_v26 = vrot.slane %v3354_v33, 2  ;;  %v1319_v15 = vsel %vm1299_vm4, %v1314_v27, %v1318_v43  ;;  %v1577_v48 = vmax.bf16 %v1521_v4, %v1478_v25 }
 0x138   :  { %v4034_v49 = vrot.slane %v1324_v28, 1  ;;  %v1195_v62 = vadd.f32 %v1096_v13, %v3829_v37  ;;  %v927_v8 = vpop.f32.mrf.mxu0  ;;  %v1479_v11 = vmax.bf16 %v1319_v15, %v3967_v53  ;;  %v4038_v5 = vpack.c.bf16 %v1250_v58, %v1249_v30 }
 0x139   :  { %v1102_v12 = vsel %vm1071_vm3, %v1099_v0, %v1101_v26  ;;  %v1097_v33 = vrot.slane %v927_v8, 2  ;;  %v4860_v27 = vrot.slane %v3990_v2, 1  ;;  %v1599_v53 = vshrl.u32 %v1577_v48, 16  ;;  %v4058_v8 = vld [vmem:[%s4840_s2 + $0x60] sm:$0xff] }
 0x13a   :  { %v1252_v37 = vadd.f32 %v4031_v24, %v1195_v62  ;;  %v1198_v4 = vadd.f32 %v1102_v12, %v3832_v45  ;;  %v3357_v25 = vpop.f32.mrf.mxu0  ;;  %v1602_v30 = vshll.u32 %v1577_v48, 16  ;;  %v1332_v58 = vshll.u32 %v4038_v5, 16  ;;  %4861 = vst [vmem:[#allocation11_spill] sm:$0xff] %v4058_v8  ;;  %v4063_v45 = vld [vmem:[%s4840_s2 + $0x68] sm:$0xff] }
 0x13b   :  { %v1523_v28 = vsel %vm675_vm2, %v1520_v47, %v4860_v27  ;;  %v1098_v15 = vsel %vm1071_vm3, %v1095_v39, %v1097_v33  ;;  %v1100_v23 = vsel %vm1071_vm3, %v1097_v33, %v1099_v0  ;;  %4862 = vst [vmem:[#allocation12_spill] sm:$0xff] %v4063_v45  ;;  %v1107_v33 = vrot.slane %v3357_v25, 2  ;;  %v4092_v25 = vld [vmem:[%s4840_s2 + $0x78] sm:$0xff] }
 0x13c   :  { %v4065_v47 = vpack.c.bf16 %v1252_v37, %v1251_v44  ;;  %v1255_v48 = vadd.f32 %v4044_v21, %v1198_v4  ;;  %v1196_v62 = vadd.f32 %v1098_v15, %v3836_v56  ;;  %v1197_v39 = vadd.f32 %v1100_v23, %v3838_v57  ;;  %v940_v12 = vpop.f32.mrf.mxu0  ;;  %v4079_v56 = vld [vmem:[%s4840_s2 + $0x90] sm:$0x3f]  ;;  %4866 = vst [vmem:[#allocation14_spill] sm:$0xff] %v4092_v25 }
 0x13d   :  { %v4070_v0 = vrot.slane %v1332_v58, 1  ;;  %v1103_v27 = vrot.slane %v940_v12, 2  ;;  %v1601_v13 = vrot.slane %v1599_v53, 7  ;;  %v4863_v23 = vmov 0 }
 0x13e   :  { %v1340_v55 = vshll.u32 %v4065_v47, 16  ;;  %v1253_v51 = vadd.f32 %v4058_v8, %v1196_v62  ;;  %v1254_v44 = vadd.f32 %v4063_v45, %v1197_v39  ;;  %v3358_v57 = vpop.f32.mrf.mxu0  ;;  %v4864_v23 = vsel %vm4083_vm8, 4294967295, %v4863_v23 }
 0x13f   :  { %4865 = vst [vmem:[#allocation13_spill] sm:$0xff] %v4864_v23  ;;  %v1202_v37 = vadd.f32 %v1107_v33, %v3840_v59  ;;  %v1104_v4 = vsel %vm1071_vm3, %v1101_v26, %v1103_v27  ;;  %v1604_v53 = vor.u32 %v1602_v30, %v1601_v13  ;;  %v1578_v58 = vmax.bf16 %v1523_v28, %v1479_v11 }
 0x140   :  { %v4094_v15 = vrot.slane %v1340_v55, 1  ;;  %v4096_v62 = vpack.c.bf16 %v1254_v44, %v1253_v51  ;;  %v1199_v39 = vadd.f32 %v1104_v4, %v3843_v7  ;;  %v943_v12 = vpop.f32.mrf.mxu0  ;;  %v4867_v57 = vshrl.u32 %v3990_v2, 16  ;;  %v4125_v4 = vld [vmem:[%s4840_s2 + $0x88] sm:$0xff] }
 0x141   :  { %v1259_v59 = vadd.f32 %v4079_v56, %v1202_v37  ;;  %v4104_v26 = vsel %vm4083_vm8, 0, %v1604_v53  ;;  %v1105_v45 = vrot.slane %v943_v12, 2  ;;  %v1606_v8 = vshrl.u32 %v1578_v58, 16  ;;  %v4120_v37 = vld [vmem:[%s4840_s2 + $0x80] sm:$0xff]  ;;  %4870 = vst [vmem:[#allocation17_spill] sm:$0xff] %v4125_v4 }
 0x142   :  { %v1322_v29 = vor.u32 %v4867_v57, %v1318_v43  ;;  %4868 = vst [vmem:[#allocation15_spill] sm:$0xff] %v4104_v26  ;;  %v1348_v11 = vshll.u32 %v4096_v62, 16  ;;  %v1256_v51 = vadd.f32 %v4092_v25, %v1199_v39  ;;  %3383 = vmatprep.mubr.msk.bf16.mxu1 %vm1785_vm7, %v4104_v26  ;;  %3427 = vmatprep.mubr.msk.bf16.mxu0 %vm1785_vm7, %v4104_v26  ;;  %v3361_v7 = vpop.f32.mrf.mxu0  ;;  %v1609_v43 = vshll.u32 %v1578_v58, 16 }
 0x143   :  { %v4113_v28 = vpack.c.bf16 %v1259_v59, %v1259_v59  ;;  %v1106_v30 = vsel %vm1071_vm3, %v1103_v27, %v1105_v45  ;;  %v1108_v44 = vsel %vm1071_vm3, %v1105_v45, %v1107_v33  ;;  %4869 = vst [vmem:[#allocation16_spill] sm:$0xff] %v4120_v37  ;;  %v1112_v53 = vrot.slane %v3361_v7, 2 }
 0x144   :  { %v4127_v39 = vrot.slane %v1348_v11, 1  ;;  %v4129_v58 = vpack.c.bf16 %v1256_v51, %v1255_v48  ;;  %v1200_v12 = vadd.f32 %v1106_v30, %v3847_v16  ;;  %v1201_v27 = vadd.f32 %v1108_v44, %v3849_v17  ;;  %v955_v45 = vpop.f32.mrf.mxu0 }
 0x145   :  { %v1372_v33 = vshll.u32 %v4113_v28, 16  ;;  %v1376_v57 = vshrl.u32 %v4113_v28, 16  ;;  %v4136_v55 = vrot.slane %v1606_v8, 7  ;;  %v1109_v30 = vrot.slane %v955_v45, 2 }
 0x146   :  { %v1356_v26 = vshll.u32 %v4129_v58, 16  ;;  %v1257_v48 = vadd.f32 %v4120_v37, %v1200_v12  ;;  %v1258_v51 = vadd.f32 %v4125_v4, %v1201_v27  ;;  %v3362_v16 = vpop.f32.mrf.mxu0  ;;  %v1327_v8 = vsel %vm1299_vm4, %v1322_v29, %v4034_v49  ;;  %v3546_v12 = vld [vmem:[%s4841_s3 + $0x20] sm:$0xff]  }
 0x147   :  { %v4142_v7 = vrot.slane %v1372_v33, 1  ;;  %v1611_v17 = vor.u32 %v1609_v43, %v4136_v55  ;;  %v1114_v44 = vrot.slane %v3362_v16, 2  ;;  %v1524_v11 = vrot.slane %v4011_v20, 1 }
 0x148   :  { %v4145_v23 = vrot.slane %v1356_v26, 1  ;;  %v4147_v59 = vpack.c.bf16 %v1258_v51, %v1257_v48  ;;  %v958_v25 = vpop.f32.mrf.mxu0  ;;  %v1480_v45 = vmax.bf16 %v1327_v8, %v3990_v2  ;;  %v4872_v48 = vrot.slane %v3990_v2, 1 }
 0x149   :  { %v4156_v27 = vor.u32 %v1376_v57, %v4142_v7  ;;  %v4159_v43 = vsel %vm1597_vm5, %v1601_v13, %v1611_v17  ;;  %v1115_v26 = vsel %vm1071_vm3, %v1112_v53, %v1114_v44  ;;  %v1110_v8 = vrot.slane %v958_v25, 2 }
 0x14a   :  { %4871 = vst [vmem:[#allocation18_spill] sm:$0xff] %v4159_v43  ;;  %v1364_v33 = vshll.u32 %v4147_v59, 16  ;;  %3384 = vmatmul.mubr.msk.bf16.vlgmr.msra.gmra.mxu1 %vm1785_vm7, %v4159_v43  ;;  %3428 = vmatmul.mubr.msk.bf16.vlgmr.msra.gmra.mxu0 %vm1785_vm7, %v4159_v43  ;;  %v1205_v57 = vadd.f32 %v1115_v26, %v3852_v32  ;;  %v1525_v13 = vsel %vm675_vm2, %v4872_v48, %v1524_v11  ;;  %v4173_v51 = vpop.f32.mrf.mxu0  ;;  %v4873_v32 = vshrl.u32 %v4011_v20, 16 }
 0x14b   :  { %3468 = vmatpush3.bf16.msra.mxu1 %v3776_v36  ;;  %v1579_v17 = vmax.bf16 %v1525_v13, %v1480_v45  ;;  %v1120_v29 = vrot.slane %v4173_v51, 2  ;;  %v1526_v26 = vrot.slane %v4038_v5, 1  ;;  %v1111_v36 = vsel %vm1071_vm3, %v1109_v30, %v1110_v8 }
 0x14c   :  { %v4179_v4 = vrot.slane %v1364_v33, 1  ;;  %v1262_v43 = vadd.f32 %v3933_v9, %v1205_v57  ;;  %v1330_v2 = vor.u32 %v4873_v32, %v4034_v49  ;;  %v971_v48 = vpop.f32.mrf.mxu0  ;;  %3469 = vmatprep.subr.bf16.mxu1 %v3546_v12  ;;  %v1113_v25 = vsel %vm1071_vm3, %v1110_v8, %v1112_v53 }
 0x14d   :  { %v1614_v37 = vshrl.u32 %v1579_v17, 16  ;;  %v1617_v16 = vshll.u32 %v1579_v17, 16  ;;  %v1203_v45 = vadd.f32 %v1111_v36, %v3856_v41  ;;  %v1204_v33 = vadd.f32 %v1113_v25, %v3858_v42 }
 0x14e   :  { %v1335_v9 = vsel %vm1299_vm4, %v1330_v2, %v4070_v0  ;;  %v1527_v57 = vsel %vm675_vm2, %v1524_v11, %v1526_v26  ;;  %v4193_v49 = vpop.f32.mrf.mxu0  ;;  %v1116_v32 = vrot.slane %v971_v48, 2  ;;  %v4874_v42 = vshrl.u32 %v4038_v5, 16 }
 0x14f   :  { %v1616_v13 = vrot.slane %v1614_v37, 7  ;;  %v1481_v51 = vmax.bf16 %v1335_v9, %v4011_v20  ;;  %v1122_v17 = vrot.slane %v4193_v49, 2  ;;  %3470 = vmatpush3.bf16.msra.mxu1 %v3546_v12  ;;  %v1260_v53 = vadd.f32 %v3919_v34, %v1203_v45 }
 0x150   :  { %v1261_v41 = vadd.f32 %v3924_v38, %v1204_v33  ;;  %v1338_v30 = vor.u32 %v4874_v42, %v4070_v0  ;;  %v1528_v8 = vrot.slane %v4065_v47, 1  ;;  %v974_v11 = vpop.f32.mrf.mxu0  ;;  %v1117_v37 = vsel %vm1071_vm3, %v1114_v44, %v1116_v32 }
 0x151   :  { %v1619_v2 = vor.u32 %v1617_v16, %v1616_v13  ;;  %v1580_v36 = vmax.bf16 %v1527_v57, %v1481_v51  ;;  %v1123_v20 = vsel %vm1071_vm3, %v1120_v29, %v1122_v17  ;;  %v1206_v34 = vadd.f32 %v1117_v37, %v3861_v3 }
 0x152   :  { %v4207_v12 = vpack.c.bf16 %v1261_v41, %v1260_v53  ;;  %v1209_v38 = vadd.f32 %v1123_v20, %v3864_v10  ;;  %v1343_v0 = vsel %vm1299_vm4, %v1338_v30, %v4094_v15  ;;  %v4213_v48 = vpop.f32.mrf.mxu0  ;;  %v1529_v51 = vsel %vm675_vm2, %v1526_v26, %v1528_v8 }
 0x153   :  { %v4217_v16 = vsel %vm1597_vm5, %v4136_v55, %v1619_v2  ;;  %v1622_v44 = vshrl.u32 %v1580_v36, 16  ;;  %v1625_v25 = vshll.u32 %v1580_v36, 16  ;;  %v1482_v45 = vmax.bf16 %v1343_v0, %v4038_v5 }
 0x154   :  { %3387 = vmatprep.mubr.msk.bf16.mxu1 %vm1785_vm7, %v4217_v16  ;;  %3431 = vmatprep.mubr.msk.bf16.mxu0 %vm1785_vm7, %v4217_v16  ;;  %v1380_v3 = vshrl.u32 %v4207_v12, 16  ;;  %v1382_v10 = vshll.u32 %v4207_v12, 16  ;;  %v1263_v33 = vadd.f32 %v3939_v52, %v1206_v34  ;;  %v1266_v9 = vadd.f32 %v3958_v54, %v1209_v38  ;;  %v987_v55 = vpop.f32.mrf.mxu0 }
 0x155   :  { %v1624_v57 = vrot.slane %v1622_v44, 7  ;;  %v1118_v53 = vrot.slane %v974_v11, 2  ;;  %v1128_v5 = vrot.slane %v4213_v48, 2  ;;  %v1581_v30 = vmax.bf16 %v1529_v51, %v1482_v45 }
 0x156   :  { %v4230_v41 = vrot.slane %v1382_v10, 1  ;;  %v4232_v42 = vpack.c.bf16 %v1263_v33, %v1262_v43  ;;  %v4875_v2 = vshrl.u32 %v4065_v47, 16  ;;  %v4237_v37 = vpop.f32.mrf.mxu0  ;;  %v1530_v26 = vrot.slane %v4096_v62, 1 }
 0x157   :  { %v1627_v52 = vor.u32 %v1625_v25, %v1624_v57  ;;  %v1119_v54 = vsel %vm1071_vm3, %v1116_v32, %v1118_v53  ;;  %v1121_v20 = vsel %vm1071_vm3, %v1118_v53, %v1120_v29  ;;  %v1630_v34 = vshrl.u32 %v1581_v30, 16 }
 0x158   :  { %v1346_v36 = vor.u32 %v4875_v2, %v4094_v15  ;;  %v1391_v11 = vshrl.u32 %v4232_v42, 16  ;;  %v1633_v38 = vshll.u32 %v1581_v30, 16  ;;  %v1207_v43 = vadd.f32 %v1119_v54, %v3868_v18  ;;  %v990_v0 = vpop.f32.mrf.mxu0 }
 0x159   :  { %v4245_v48 = vsel %vm1597_vm5, %v1616_v13, %v1627_v52  ;;  %v1208_v15 = vadd.f32 %v1121_v20, %v3870_v19  ;;  %v1531_v32 = vsel %vm675_vm2, %v1528_v8, %v1530_v26  ;;  %v1632_v29 = vrot.slane %v1630_v34, 7 }
 0x15a   :  { %v1351_v44 = vsel %vm1299_vm4, %v1346_v36, %v4127_v39  ;;  %3388 = vmatmul.mubr.msk.bf16.gmra.mxu1 %vm1785_vm7, %v4245_v48  ;;  %3432 = vmatmul.mubr.msk.bf16.gmra.mxu0 %vm1785_vm7, %v4245_v48  ;;  %v1264_v18 = vadd.f32 %v3965_v46, %v1207_v43  ;;  %v1124_v13 = vrot.slane %v987_v55, 2  ;;  %v4257_v45 = vpop.f32.mrf.mxu0  ;;  %v1130_v10 = vrot.slane %v4237_v37, 2 }
 0x15b   :  { %v1483_v25 = vmax.bf16 %v1351_v44, %v4065_v47  ;;  %v1265_v19 = vadd.f32 %v3973_v60, %v1208_v15  ;;  %v4876_v8 = vshrl.u32 %v4096_v62, 16  ;;  %v1532_v51 = vrot.slane %v4129_v58, 1 }
 0x15c   :  { %v1635_v53 = vor.u32 %v1633_v38, %v1632_v29  ;;  %v1125_v46 = vsel %vm1071_vm3, %v1122_v17, %v1124_v13  ;;  %v1126_v47 = vrot.slane %v990_v0, 2  ;;  %v4268_v55 = vpop.f32.mrf.mxu0  ;;  %v1131_v36 = vsel %vm1071_vm3, %v1128_v5, %v1130_v10 }
 0x15d   :  { %v1354_v33 = vor.u32 %v4876_v8, %v4127_v39  ;;  %v1582_v30 = vmax.bf16 %v1531_v32, %v1483_v25  ;;  %v4270_v2 = vpack.c.bf16 %v1265_v19, %v1264_v18  ;;  %v1210_v60 = vadd.f32 %v1125_v46, %v3873_v31 }
 0x15e   :  { %v4277_v37 = vsel %vm1597_vm5, %v1624_v57, %v1635_v53  ;;  %v1213_v49 = vadd.f32 %v1131_v36, %v3876_v40  ;;  %v4280_v17 = vpop.f32.mrf.mxu0  ;;  %v1533_v40 = vsel %vm675_vm2, %v1530_v26, %v1532_v51  ;;  %v1127_v0 = vsel %vm1071_vm3, %v1124_v13, %v1126_v47 }
 0x15f   :  { %v1359_v39 = vsel %vm1299_vm4, %v1354_v33, %v4145_v23  ;;  %v1638_v52 = vshrl.u32 %v1582_v30, 16  ;;  %v1641_v54 = vshll.u32 %v1582_v30, 16  ;;  %3391 = vmatprep.mubr.msk.bf16.mxu1 %vm1785_vm7, %v4277_v37  ;;  %3435 = vmatprep.mubr.msk.bf16.mxu0 %vm1785_vm7, %v4277_v37  ;;  %v1395_v31 = vshll.u32 %v4270_v2, 16 }
 0x160   :  { %v1399_v20 = vshrl.u32 %v4270_v2, 16  ;;  %v1267_v34 = vadd.f32 %v3985_v50, %v1210_v60  ;;  %v1484_v57 = vmax.bf16 %v1359_v39, %v4096_v62  ;;  %v1270_v43 = vadd.f32 %v3996_v35, %v1213_v49  ;;  %v1006_v15 = vpop.f32.mrf.mxu0 }
 0x161   :  { %v1640_v38 = vrot.slane %v1638_v52, 7  ;;  %v4293_v44 = vrot.slane %v1395_v31, 1  ;;  %v1129_v25 = vsel %vm1071_vm3, %v1126_v47, %v1128_v5  ;;  %v1211_v50 = vadd.f32 %v1127_v0, %v3880_v1 }
 0x162   :  { %v4295_v32 = vpack.c.bf16 %v1267_v34, %v1266_v9  ;;  %v1583_v18 = vmax.bf16 %v1533_v40, %v1484_v57  ;;  %v1212_v62 = vadd.f32 %v1129_v25, %v3882_v63  ;;  %v1136_v8 = vrot.slane %v4257_v45, 2  ;;  %v4301_v35 = vpop.f32.mrf.mxu0 }
 0x163   :  { %v1643_v19 = vor.u32 %v1641_v54, %v1640_v38  ;;  %v1268_v5 = vadd.f32 %v4009_v6, %v1211_v50  ;;  %v4877_v1 = vshrl.u32 %v4129_v58, 16  ;;  %v1534_v47 = vrot.slane %v4147_v59, 1 }
 0x164   :  { %v1403_v26 = vshll.u32 %v4295_v32, 16  ;;  %v1407_v13 = vshrl.u32 %v4295_v32, 16  ;;  %v1646_v33 = vshrl.u32 %v1583_v18, 16  ;;  %v1649_v53 = vshll.u32 %v1583_v18, 16  ;;  %v4313_v45 = vpop.f32.mrf.mxu0 }
 0x165   :  { %v4306_v9 = vsel %vm1597_vm5, %v1632_v29, %v1643_v19  ;;  %v1269_v30 = vadd.f32 %v4019_v61, %v1212_v62  ;;  %v1362_v63 = vor.u32 %v4877_v1, %v4145_v23  ;;  %v1132_v6 = vrot.slane %v4268_v55, 2 }
 0x166   :  { %3392 = vmatmul.mubr.msk.bf16.gmra.mxu1 %vm1785_vm7, %v4306_v9  ;;  %3436 = vmatmul.mubr.msk.bf16.gmra.mxu0 %vm1785_vm7, %v4306_v9  ;;  %v4319_v46 = vrot.slane %v1403_v26, 1  ;;  %v1648_v29 = vrot.slane %v1646_v33, 7  ;;  %v4878_v60 = vshrl.u32 %v4147_v59, 16  ;;  %v1138_v39 = vrot.slane %v4280_v17, 2  ;;  %v3378_v52 = vpop.f32.mrf.mxu0 }
 0x167   :  { %v4323_v61 = vpack.c.bf16 %v1269_v30, %v1268_v5  ;;  %v1367_v23 = vsel %vm1299_vm4, %v1362_v63, %v4179_v4  ;;  %v1535_v31 = vsel %vm675_vm2, %v1532_v51, %v1534_v47  ;;  %v1133_v34 = vsel %vm1071_vm3, %v1130_v10, %v1132_v6 }
 0x168   :  { %v1370_v36 = vor.u32 %v4878_v60, %v4179_v4  ;;  %v1651_v54 = vor.u32 %v1649_v53, %v1648_v29  ;;  %v1485_v49 = vmax.bf16 %v1367_v23, %v4129_v58  ;;  %v1214_v40 = vadd.f32 %v1133_v34, %v3885_v22 }
 0x169   :  { %v1411_v55 = vshll.u32 %v4323_v61, 16  ;;  %v1415_v57 = vshrl.u32 %v4323_v61, 16  ;;  %v4879_v58 = vrot.slane %v4113_v28, 1  ;;  %v1139_v10 = vsel %vm1071_vm3, %v1136_v8, %v1138_v39 }
 0x16a   :  { %v1375_v0 = vsel %vm1299_vm4, %v1370_v36, %v4142_v7  ;;  %v4340_v4 = vsel %vm1597_vm5, %v1640_v38, %v1651_v54  ;;  %v1584_v17 = vmax.bf16 %v1535_v31, %v1485_v49  ;;  %v1271_v7 = vadd.f32 %v4031_v24, %v1214_v40  ;;  %v4885_v31 = vld [vmem:[#allocation11_spill] sm:$0xff] }
 0x16b   :  { %v1486_v18 = vmax.bf16 %v1375_v0, %v4147_v59  ;;  %v1537_v51 = vsel %vm675_vm2, %v1534_v47, %v4879_v58  ;;  %3395 = vmatprep.mubr.msk.bf16.mxu1 %vm1785_vm7, %v4340_v4  ;;  %3439 = vmatprep.mubr.msk.bf16.mxu0 %vm1785_vm7, %v4340_v4  ;;  %v4350_v22 = vrot.slane %v1411_v55, 1  ;;  %v1134_v38 = vrot.slane %v1006_v15, 2  ;;  %v4880_v47 = vld [vmem:[#allocation5_spill] sm:$0xff]  ;;  %v4886_v55 = vld [vmem:[#allocation12_spill] sm:$0xff] }
 0x16c   :  { %v1654_v59 = vshrl.u32 %v1584_v17, 16  ;;  %v1657_v25 = vshll.u32 %v1584_v17, 16  ;;  %v1217_v50 = vadd.f32 %v1139_v10, %v3888_v14  ;;  %v4355_v62 = vpack.c.bf16 %v1271_v7, %v1270_v43  ;;  %v4881_v14 = vld [vmem:[#allocation6_spill] sm:$0xff] }
 0x16d   :  { %v1585_v19 = vmax.bf16 %v1537_v51, %v1486_v18  ;;  %v1135_v26 = vsel %vm1071_vm3, %v1132_v6, %v1134_v38  ;;  %v1137_v33 = vsel %vm1071_vm3, %v1134_v38, %v1136_v8  ;;  %v1144_v53 = vrot.slane %v4301_v35, 2  ;;  %v4882_v6 = vld [vmem:[#allocation7_spill] sm:$0xff]  ;;  %v4887_v38 = vld [vmem:[#allocation8_spill] sm:$0xff] }
 0x16e   :  { %v1656_v5 = vrot.slane %v1654_v59, 7  ;;  %v1274_v15 = vadd.f32 %v4044_v21, %v1217_v50  ;;  %v1419_v1 = vshll.u32 %v4355_v62, 16  ;;  %v1423_v63 = vshrl.u32 %v4355_v62, 16 }
 0x16f   :  { %v1662_v24 = vshrl.u32 %v1585_v19, 16  ;;  %v1665_v30 = vshll.u32 %v1585_v19, 16  ;;  %v1215_v23 = vadd.f32 %v1135_v26, %v4880_v47  ;;  %v1216_v43 = vadd.f32 %v1137_v33, %v4881_v14  ;;  %v1022_v19 = vpop.f32.mrf.mxu0 }
 0x170   :  { %v1659_v60 = vor.u32 %v1657_v25, %v1656_v5  ;;  %v1221_v8 = vadd.f32 %v1144_v53, %v4882_v6  ;;  %v4883_v52 = vmax.bf16 %v4156_v27, %v4113_v28  ;;  %v4884_v54 = vmov %v4879_v58 }
 0x171   :  { %v1664_v36 = vrot.slane %v1662_v24, 7  ;;  %v4373_v49 = vrot.slane %v1419_v1, 1  ;;  %v1272_v34 = vadd.f32 %v4885_v31, %v1215_v23  ;;  %v1273_v40 = vadd.f32 %v4886_v55, %v1216_v43  ;;  %v4890_v1 = vld [vmem:[#allocation14_spill] sm:$0xff] }
 0x172   :  { %v1586_v21 = vmax.bf16 %v4884_v54, %v4883_v52  ;;  %v1140_v0 = vrot.slane %v4313_v45, 2  ;;  %v4379_v17 = vsel %vm1597_vm5, %v1648_v29, %v1659_v60  ;;  %v1278_v58 = vadd.f32 %v4079_v56, %v1221_v8 }
 0x173   :  { %v1667_v18 = vor.u32 %v1665_v30, %v1664_v36  ;;  %3396 = vmatmul.mubr.msk.bf16.gmra.mxu1 %vm1785_vm7, %v4379_v17  ;;  %3440 = vmatmul.mubr.msk.bf16.gmra.mxu0 %vm1785_vm7, %v4379_v17  ;;  %v4386_v28 = vpack.c.bf16 %v1273_v40, %v1272_v34  ;;  %v1385_v45 = vor.u32 %v4230_v41, %v1380_v3  ;;  %v1387_v3 = vshll.u32 %v4232_v42, 16 }
 0x174   :  { %v1670_v51 = vshrl.u32 %v1586_v21, 16  ;;  %v1673_v27 = vshll.u32 %v1586_v21, 16  ;;  %v1141_v7 = vsel %vm1071_vm3, %v1138_v39, %v1140_v0  ;;  %v4395_v56 = vpack.c.bf16 %v1278_v58, %v1278_v58  ;;  %v4891_v58 = vld [vmem:[#allocation9_spill] sm:$0xff] }
 0x175   :  { %v4393_v29 = vsel %vm1597_vm5, %v1656_v5, %v1667_v18  ;;  %v1218_v59 = vadd.f32 %v1141_v7, %v4887_v38  ;;  %v1427_v39 = vshll.u32 %v4386_v28, 16  ;;  %v1431_v25 = vshrl.u32 %v4386_v28, 16  ;;  %v4893_v38 = vld [vmem:[#allocation16_spill] sm:$0xff] }
 0x176   :  { %v1672_v10 = vrot.slane %v1670_v51, 7  ;;  %3399 = vmatprep.mubr.msk.bf16.mxu1 %vm1785_vm7, %v4393_v29  ;;  %3443 = vmatprep.mubr.msk.bf16.mxu0 %vm1785_vm7, %v4393_v29  ;;  %v1538_v41 = vrot.slane %v4207_v12, 1  ;;  %v1451_v50 = vshll.u32 %v4395_v56, 16  ;;  %v1455_v26 = vshrl.u32 %v4395_v56, 16 }
 0x177   :  { %v1555_v33 = vrot.slane %v4395_v56, 1  ;;  %v4415_v30 = vrot.slane %v1427_v39, 1  ;;  %v1275_v47 = vadd.f32 %v4890_v1, %v1218_v59  ;;  %v1389_v23 = vrot.slane %v1387_v3, 1 }
 0x178   :  { %v1675_v5 = vor.u32 %v1673_v27, %v1672_v10  ;;  %v1539_v14 = vrot.slane %v4232_v42, 1  ;;  %v4419_v43 = vrot.slane %v1451_v50, 1  ;;  %v1142_v6 = vrot.slane %v1022_v19, 2  ;;  %v4892_v27 = vld [vmem:[#allocation10_spill] sm:$0xff] }
 0x179   :  { %v1541_v8 = vrot.slane %v4270_v2, 1  ;;  %v4427_v54 = vpack.c.bf16 %v1275_v47, %v1274_v15  ;;  %v1390_v21 = vsel %vm1299_vm4, %v1385_v45, %v1389_v23  ;;  %v1393_v31 = vor.u32 %v1391_v11, %v1389_v23 }
 0x17a   :  { %v1676_v60 = vsel %vm1597_vm5, %v1664_v36, %v1675_v5  ;;  %v4433_v34 = vor.u32 %v1455_v26, %v4419_v43  ;;  %v1488_v55 = vmax.bf16 %v1390_v21, %v4207_v12  ;;  %v1540_v36 = vsel %vm675_vm2, %v1538_v41, %v1539_v14  ;;  %v4894_v41 = vld [vmem:[#allocation17_spill] sm:$0xff] }
 0x17b   :  { %v4425_v52 = vsel %vm4411_vm11, %v1676_v60, 0  ;;  %v1143_v40 = vsel %vm1071_vm3, %v1140_v0, %v1142_v6  ;;  %v1435_v15 = vshll.u32 %v4427_v54, 16  ;;  %v1439_v18 = vshrl.u32 %v4427_v54, 16 }
 0x17c   :  { %3400 = vmatmul.mubr.msk.bf16.gmra.mxu1 %vm1785_vm7, %v4425_v52  ;;  %3444 = vmatmul.mubr.msk.bf16.gmra.mxu0 %vm1785_vm7, %v4425_v52  ;;  %v1145_v11 = vsel %vm1071_vm3, %v1142_v6, %v1144_v53  ;;  %v1219_v12 = vadd.f32 %v1143_v40, %v4891_v58  ;;  %v1497_v51 = vmax.bf16 %v4433_v34, %v4395_v56  ;;  %v1543_v5 = vrot.slane %v4295_v32, 1 }
 0x17d   :  { %v1587_v0 = vmax.bf16 %v1540_v36, %v1488_v55  ;;  %v1220_v7 = vadd.f32 %v1145_v11, %v4892_v27  ;;  %v1398_v45 = vsel %vm1299_vm4, %v1393_v31, %v4293_v44  ;;  %v4453_v10 = vrot.slane %v1435_v15, 1 }
 0x17e   :  { %v1276_v59 = vadd.f32 %v4893_v38, %v1219_v12  ;;  %v1489_v39 = vmax.bf16 %v1398_v45, %v4232_v42  ;;  %v1542_v35 = vsel %vm675_vm2, %v1539_v14, %v1541_v8  ;;  %v1401_v50 = vor.u32 %v1399_v20, %v4293_v44 }
 0x17f   :  { %v1678_v53 = vshrl.u32 %v1587_v0, 16  ;;  %v1681_v3 = vshll.u32 %v1587_v0, 16  ;;  %v1277_v19 = vadd.f32 %v4894_v41, %v1220_v7  ;;  %v1409_v1 = vor.u32 %v1407_v13, %v4319_v46 }
 0x180   :  { %v1588_v26 = vmax.bf16 %v1542_v35, %v1489_v39  ;;  %v1545_v47 = vrot.slane %v4323_v61, 1  ;;  %v1406_v14 = vsel %vm1299_vm4, %v1401_v50, %v4319_v46  ;;  %v1417_v60 = vor.u32 %v1415_v57, %v4350_v22 }
 0x181   :  { %v1680_v42 = vrot.slane %v1678_v53, 7  ;;  %v4467_v23 = vpack.c.bf16 %v1277_v19, %v1276_v59  ;;  %v1490_v6 = vmax.bf16 %v1406_v14, %v4270_v2  ;;  %v1544_v21 = vsel %vm675_vm2, %v1541_v8, %v1543_v5 }
 0x182   :  { %v1685_v20 = vshrl.u32 %v1588_v26, 16  ;;  %v1688_v44 = vshll.u32 %v1588_v26, 16  ;;  %v1414_v36 = vsel %vm1299_vm4, %v1409_v1, %v4350_v22  ;;  %v1546_v57 = vsel %vm675_vm2, %v1543_v5, %v1545_v47 }
 0x183   :  { %v1683_v31 = vor.u32 %v1681_v3, %v1680_v42  ;;  %v1443_v13 = vshll.u32 %v4467_v23, 16  ;;  %v1447_v55 = vshrl.u32 %v4467_v23, 16  ;;  %v1589_v46 = vmax.bf16 %v1544_v21, %v1490_v6 }
 0x184   :  { %v1687_v40 = vrot.slane %v1685_v20, 7  ;;  %v1491_v15 = vmax.bf16 %v1414_v36, %v4295_v32  ;;  %v1422_v8 = vsel %vm1299_vm4, %v1417_v60, %v4373_v49  ;;  %v1547_v12 = vrot.slane %v4355_v62, 1 }
 0x185   :  { %v4484_v58 = vsel %vm4083_vm8, 0, %v1683_v31  ;;  %v1445_v2 = vrot.slane %v1443_v13, 1  ;;  %v1693_v32 = vshrl.u32 %v1589_v46, 16  ;;  %v1696_v0 = vshll.u32 %v1589_v46, 16 }
 0x186   :  { %3403 = vmatprep.mubr.msk.bf16.mxu1 %vm1785_vm7, %v4484_v58  ;;  %3447 = vmatprep.mubr.msk.bf16.mxu0 %vm1785_vm7, %v4484_v58  ;;  %v1690_v22 = vor.u32 %v1688_v44, %v1687_v40  ;;  %v1590_v27 = vmax.bf16 %v1546_v57, %v1491_v15  ;;  %v1492_v7 = vmax.bf16 %v1422_v8, %v4323_v61  ;;  %v1549_v59 = vrot.slane %v4386_v28, 1 }
 0x187   :  { %v1548_v45 = vsel %vm675_vm2, %v1545_v47, %v1547_v12  ;;  %v1425_v38 = vor.u32 %v1423_v63, %v4373_v49  ;;  %v1695_v35 = vrot.slane %v1693_v32, 7  ;;  %v1551_v49 = vrot.slane %v4427_v54, 1 }
 0x188   :  { %v4500_v39 = vsel %vm1597_vm5, %v1680_v42, %v1690_v22  ;;  %v1701_v53 = vshrl.u32 %v1590_v27, 16  ;;  %v1704_v3 = vshll.u32 %v1590_v27, 16  ;;  %v1591_v61 = vmax.bf16 %v1548_v45, %v1492_v7 }
 0x189   :  { %3404 = vmatmul.mubr.msk.bf16.gmra.mxu1 %vm1785_vm7, %v4500_v39  ;;  %3448 = vmatmul.mubr.msk.bf16.gmra.mxu0 %vm1785_vm7, %v4500_v39  ;;  %v1430_v41 = vsel %vm1299_vm4, %v1425_v38, %v4415_v30  ;;  %v1550_v63 = vsel %vm675_vm2, %v1547_v12, %v1549_v59  ;;  %v1698_v19 = vor.u32 %v1696_v0, %v1695_v35 }
 0x18a   :  { %v1703_v50 = vrot.slane %v1701_v53, 7  ;;  %v1493_v26 = vmax.bf16 %v1430_v41, %v4355_v62  ;;  %v1433_v5 = vor.u32 %v1431_v25, %v4415_v30  ;;  %v1709_v1 = vshrl.u32 %v1591_v61, 16 }
 0x18b   :  { %v1712_v47 = vshll.u32 %v1591_v61, 16  ;;  %v1552_v42 = vsel %vm675_vm2, %v1549_v59, %v1551_v49  ;;  %v1441_v14 = vor.u32 %v1439_v18, %v4453_v10  ;;  %v4519_v60 = vsel %vm1597_vm5, %v1687_v40, %v1698_v19 }
 0x18c   :  { %v1706_v20 = vor.u32 %v1704_v3, %v1703_v50  ;;  %v1592_v44 = vmax.bf16 %v1550_v63, %v1493_v26  ;;  %v1438_v62 = vsel %vm1299_vm4, %v1433_v5, %v4453_v10  ;;  %3407 = vmatprep.mubr.msk.bf16.mxu1 %vm1785_vm7, %v4519_v60  ;;  %3451 = vmatprep.mubr.msk.bf16.mxu0 %vm1785_vm7, %v4519_v60  ;;  %v1711_v25 = vrot.slane %v1709_v1, 7  ;;  %v4896_v26 = vld [vmem:[#allocation15_spill] sm:$0xff]  ;;  %v4897_v5 = vld [vmem:[#allocation18_spill] sm:$0xff] }
 0x18d   :  { %v1494_v30 = vmax.bf16 %v1438_v62, %v4386_v28  ;;  %v1446_v6 = vsel %vm1299_vm4, %v1441_v14, %v1445_v2  ;;  %v1553_v18 = vrot.slane %v4467_v23, 1  ;;  %v1449_v15 = vor.u32 %v1447_v55, %v1445_v2 }
 0x18e   :  { %v4531_v21 = vsel %vm1597_vm5, %v1695_v35, %v1706_v20  ;;  %v1717_v31 = vshrl.u32 %v1592_v44, 16  ;;  %v1720_v13 = vshll.u32 %v1592_v44, 16  ;;  %v1495_v10 = vmax.bf16 %v1446_v6, %v4427_v54 }
 0x18f   :  { %v1714_v36 = vor.u32 %v1712_v47, %v1711_v25  ;;  %v1593_v40 = vmax.bf16 %v1552_v42, %v1494_v30  ;;  %v1554_v46 = vsel %vm675_vm2, %v1551_v49, %v1553_v18  ;;  %v1556_v28 = vsel %vm675_vm2, %v1553_v18, %v1555_v33 }
 0x190   :  { %v1719_v57 = vrot.slane %v1717_v31, 7  ;;  %v1594_v11 = vmax.bf16 %v1554_v46, %v1495_v10  ;;  %v1596_v8 = vmax.bf16 %v1555_v33, %v1497_v51  ;;  %v1454_v2 = vsel %vm1299_vm4, %v1449_v15, %v4419_v43 }
 0x191   :  { %3408 = vmatmul.mubr.msk.bf16.gmra.mxu1 %vm1785_vm7, %v4531_v21  ;;  %3452 = vmatmul.mubr.msk.bf16.gmra.mxu0 %vm1785_vm7, %v4531_v21  ;;  %v1715_v54 = vsel %vm1597_vm5, %v1703_v50, %v1714_v36  ;;  %v1725_v55 = vshrl.u32 %v1593_v40, 16  ;;  %v1496_v56 = vmax.bf16 %v1454_v2, %v4467_v23  ;;  %v1728_v51 = vshll.u32 %v1593_v40, 16 }
 0x192   :  { %3411 = vmatprep.mubr.msk.bf16.mxu1 %vm1785_vm7, %v1715_v54  ;;  %3455 = vmatprep.mubr.msk.bf16.mxu0 %vm1785_vm7, %v1715_v54  ;;  %v1722_v34 = vor.u32 %v1720_v13, %v1719_v57  ;;  %v1733_v12 = vshrl.u32 %v1594_v11, 16  ;;  %v1749_v22 = vshrl.u32 %v1596_v8, 16  ;;  %v1736_v27 = vshll.u32 %v1594_v11, 16 }
 0x193   :  { %v1727_v33 = vrot.slane %v1725_v55, 7  ;;  %v1595_v7 = vmax.bf16 %v1556_v28, %v1496_v56  ;;  %v1752_v35 = vshll.u32 %v1596_v8, 16 }
 0x194   :  { %v1723_v32 = vsel %vm1597_vm5, %v1711_v25, %v1722_v34  ;;  %v1735_v0 = vrot.slane %v1733_v12, 7  ;;  %v1751_v38 = vrot.slane %v1749_v22, 7 }
 0x195   :  { %v1730_v45 = vor.u32 %v1728_v51, %v1727_v33  ;;  %v1741_v43 = vshrl.u32 %v1595_v7, 16  ;;  %v1744_v41 = vshll.u32 %v1595_v7, 16 }
 0x196   :  { %v1738_v59 = vor.u32 %v1736_v27, %v1735_v0  ;;  %v1754_v23 = vor.u32 %v1752_v35, %v1751_v38 }
 0x197   :  { %v1731_v53 = vsel %vm1597_vm5, %v1719_v57, %v1730_v45  ;;  %v1743_v61 = vrot.slane %v1741_v43, 7 }
 0x198   :  { %v1739_v3 = vsel %vm1597_vm5, %v1727_v33, %v1738_v59 }
 0x199   :  { %3412 = vmatmul.mubr.msk.bf16.gmra.mxu1 %vm1785_vm7, %v1723_v32  ;;  %3456 = vmatmul.mubr.msk.bf16.gmra.mxu0 %vm1785_vm7, %v1723_v32  ;;  %v1746_v63 = vor.u32 %v1744_v41, %v1743_v61  ;;  %v1755_v49 = vsel %vm1597_vm5, %v1743_v61, %v1754_v23 }
 0x19a   :  { %3415 = vmatprep.mubr.msk.bf16.mxu1 %vm1785_vm7, %v1731_v53  ;;  %3459 = vmatprep.mubr.msk.bf16.mxu0 %vm1785_vm7, %v1731_v53  ;;  %v1768_v50 = vsel %vm4411_vm11, %v1755_v49, 0 }
 0x19b   :  { %v1747_v19 = vsel %vm1597_vm5, %v1735_v0, %v1746_v63 }
 0x1a1   :  { %3416 = vmatmul.mubr.msk.bf16.gmra.mxu1 %vm1785_vm7, %v1739_v3  ;;  %3460 = vmatmul.mubr.msk.bf16.gmra.mxu0 %vm1785_vm7, %v1739_v3 }
 0x1a2   :  { %3419 = vmatprep.mubr.msk.bf16.mxu1 %vm1785_vm7, %v1747_v19  ;;  %3463 = vmatprep.mubr.msk.bf16.mxu0 %vm1785_vm7, %v1747_v19 }
 0x1a9   :  { %3420 = vmatmul.mubr.msk.bf16.gmra.mxu1 %vm1785_vm7, %v1768_v50  ;;  %3464 = vmatmul.mubr.msk.bf16.gmra.mxu0 %vm1785_vm7, %v1768_v50 }
 0x1aa   :  { %3471 = vmatprep.mubr.msk.bf16.mxu1 %vm1785_vm7, %v4896_v26 }
 0x1b1   :  { %3472 = vmatmul.mubr.msk.bf16.vlgmr.msra.gmra.mxu1 %vm1785_vm7, %v4897_v5 }
 0x1b2   :  { %3475 = vmatprep.mubr.msk.bf16.mxu1 %vm1785_vm7, %v4217_v16 }
 0x1b9   :  { %3476 = vmatmul.mubr.msk.bf16.gmra.mxu1 %vm1785_vm7, %v4245_v48 }
 0x1ba   :  { %3479 = vmatprep.mubr.msk.bf16.mxu1 %vm1785_vm7, %v4277_v37 }
 0x1c1   :  { %3480 = vmatmul.mubr.msk.bf16.gmra.mxu1 %vm1785_vm7, %v4306_v9 }
 0x1c2   :  { %3483 = vmatprep.mubr.msk.bf16.mxu1 %vm1785_vm7, %v4340_v4 }
 0x1c9   :  { %3484 = vmatmul.mubr.msk.bf16.gmra.mxu1 %vm1785_vm7, %v4379_v17 }
 0x1ca   :  { %3487 = vmatprep.mubr.msk.bf16.mxu1 %vm1785_vm7, %v4393_v29 }
 0x1d1   :  { %3488 = vmatmul.mubr.msk.bf16.gmra.mxu1 %vm1785_vm7, %v4425_v52 }
 0x1d2   :  { %3491 = vmatprep.mubr.msk.bf16.mxu1 %vm1785_vm7, %v4484_v58 }
 0x1d9   :  { %3492 = vmatmul.mubr.msk.bf16.gmra.mxu1 %vm1785_vm7, %v4500_v39 }
 0x1da   :  { %3495 = vmatprep.mubr.msk.bf16.mxu1 %vm1785_vm7, %v4519_v60 }
 0x1e1   :  { %3496 = vmatmul.mubr.msk.bf16.gmra.mxu1 %vm1785_vm7, %v4531_v21 }
 0x1e2   :  { %3499 = vmatprep.mubr.msk.bf16.mxu1 %vm1785_vm7, %v1715_v54 }
 0x1e9   :  { %3500 = vmatmul.mubr.msk.bf16.gmra.mxu1 %vm1785_vm7, %v1723_v32 }
 0x1ea   :  { %3503 = vmatprep.mubr.msk.bf16.mxu1 %vm1785_vm7, %v1731_v53 }
 0x1f1   :  { %3504 = vmatmul.mubr.msk.bf16.gmra.mxu1 %vm1785_vm7, %v1739_v3 }
 0x1f2   :  { %3507 = vmatprep.mubr.msk.bf16.mxu1 %vm1785_vm7, %v1747_v19 }
 0x1f9   :  { %3508 = vmatmul.mubr.msk.bf16.gmra.mxu1 %vm1785_vm7, %v1768_v50 }
 0x20a   :  { %v3385_v16 = vpop.f32.mrf.mxu1  ;;  %v3429_v48 = vpop.f32.mrf.mxu0 }
 0x20b   :  { %v2286_v17 = vrot.slane %v3429_v48, 1 }
 0x20c   :  { %v1880_v37 = vpop.f32.mrf.mxu1  ;;  %v2088_v9 = vpop.f32.mrf.mxu0 }
 0x20d   :  { %v2283_v58 = vrot.slane %v2088_v9, 1 }
 0x20e   :  { %v3430_v4 = vpop.f32.mrf.mxu0  ;;  %v3386_v29 = vpop.f32.mrf.mxu1 }
 0x20f   :  { %v2288_v24 = vrot.slane %v3430_v4, 1 }
 0x210   :  { %v2091_v52 = vpop.f32.mrf.mxu0  ;;  %v1883_v42 = vpop.f32.mrf.mxu1 }
 0x211   :  { %v2289_v39 = vsel %vm675_vm2, %v2286_v17, %v2288_v24  ;;  %v2284_v1 = vrot.slane %v2091_v52, 1 }
 0x212   :  { %v4605_v47 = vadd.f32 %v3385_v16, %v2289_v39 }
 0x213   :  { %v2285_v14 = vsel %vm675_vm2, %v2283_v58, %v2284_v1  ;;  %v2287_v60 = vsel %vm675_vm2, %v2284_v1, %v2286_v17 }
 0x214   :  { %v4609_v20 = vadd.f32 %v2285_v14, %v1880_v37  ;;  %v4611_v44 = vadd.f32 %v2287_v60, %v1883_v42 }
 0x21a   :  { %v3389_v62 = vpop.f32.mrf.mxu1  ;;  %v3433_v25 = vpop.f32.mrf.mxu0 }
 0x21b   :  { %v2294_v13 = vrot.slane %v3433_v25, 1 }
 0x21c   :  { %v1896_v30 = vpop.f32.mrf.mxu1  ;;  %v2104_v6 = vpop.f32.mrf.mxu0 }
 0x21d   :  { %v2290_v18 = vrot.slane %v2104_v6, 1 }
 0x21e   :  { %v3390_v21 = vpop.f32.mrf.mxu1  ;;  %v3434_v31 = vpop.f32.mrf.mxu0 }
 0x21f   :  { %v2291_v10 = vsel %vm675_vm2, %v2288_v24, %v2290_v18  ;;  %v2296_v36 = vrot.slane %v3434_v31, 1 }
 0x220   :  { %v4614_v40 = vadd.f32 %v3386_v29, %v2291_v10  ;;  %v2107_v46 = vpop.f32.mrf.mxu0  ;;  %v1899_v57 = vpop.f32.mrf.mxu1 }
 0x221   :  { %v2297_v15 = vsel %vm675_vm2, %v2294_v13, %v2296_v36  ;;  %v2292_v11 = vrot.slane %v2107_v46, 1 }
 0x222   :  { %v4617_v28 = vadd.f32 %v3389_v62, %v2297_v15 }
 0x223   :  { %v2293_v8 = vsel %vm675_vm2, %v2290_v18, %v2292_v11  ;;  %v2295_v54 = vsel %vm675_vm2, %v2292_v11, %v2294_v13 }
 0x224   :  { %v4621_v55 = vadd.f32 %v2293_v8, %v1896_v30  ;;  %v4623_v2 = vadd.f32 %v2295_v54, %v1899_v57 }
 0x226   :  { %v3393_v34 = vpop.f32.mrf.mxu1  ;;  %v3437_v12 = vpop.f32.mrf.mxu0 }
 0x227   :  { %v2302_v32 = vrot.slane %v3437_v12, 1 }
 0x228   :  { %v1912_v56 = vpop.f32.mrf.mxu1  ;;  %v2120_v33 = vpop.f32.mrf.mxu0 }
 0x229   :  { %v2298_v51 = vrot.slane %v2120_v33, 1 }
 0x22a   :  { %v3438_v22 = vpop.f32.mrf.mxu0  ;;  %v3394_v27 = vpop.f32.mrf.mxu1 }
 0x22b   :  { %v2299_v0 = vsel %vm675_vm2, %v2296_v36, %v2298_v51  ;;  %v2304_v7 = vrot.slane %v3438_v22, 1 }
 0x22c   :  { %v4626_v45 = vadd.f32 %v3390_v21, %v2299_v0  ;;  %v2123_v38 = vpop.f32.mrf.mxu0  ;;  %v1915_v53 = vpop.f32.mrf.mxu1 }
 0x22d   :  { %v2305_v59 = vsel %vm675_vm2, %v2302_v32, %v2304_v7  ;;  %v2300_v43 = vrot.slane %v2123_v38, 1 }
 0x22e   :  { %v4629_v35 = vadd.f32 %v3393_v34, %v2305_v59 }
 0x22f   :  { %v2301_v3 = vsel %vm675_vm2, %v2298_v51, %v2300_v43  ;;  %v2303_v61 = vsel %vm675_vm2, %v2300_v43, %v2302_v32 }
 0x230   :  { %v4633_v41 = vadd.f32 %v2301_v3, %v1912_v56  ;;  %v4635_v23 = vadd.f32 %v2303_v61, %v1915_v53 }
 0x233   :  { %v3397_v63 = vpop.f32.mrf.mxu1  ;;  %v3441_v49 = vpop.f32.mrf.mxu0 }
 0x234   :  { %v2310_v48 = vrot.slane %v3441_v49, 1 }
 0x235   :  { %v1928_v19 = vpop.f32.mrf.mxu1  ;;  %v2136_v50 = vpop.f32.mrf.mxu0 }
 0x236   :  { %v2306_v26 = vrot.slane %v2136_v50, 1 }
 0x237   :  { %v3398_v5 = vpop.f32.mrf.mxu1  ;;  %v3442_v16 = vpop.f32.mrf.mxu0 }
 0x238   :  { %v2307_v37 = vsel %vm675_vm2, %v2304_v7, %v2306_v26  ;;  %v2312_v9 = vrot.slane %v3442_v16, 1 }
 0x239   :  { %v4638_v4 = vadd.f32 %v3394_v27, %v2307_v37  ;;  %v1931_v17 = vpop.f32.mrf.mxu1  ;;  %v2139_v29 = vpop.f32.mrf.mxu0 }
 0x23a   :  { %v2313_v24 = vsel %vm675_vm2, %v2310_v48, %v2312_v9  ;;  %v2308_v52 = vrot.slane %v2139_v29, 1 }
 0x23b   :  { %v4641_v58 = vadd.f32 %v3397_v63, %v2313_v24 }
 0x23c   :  { %v3401_v39 = vpop.f32.mrf.mxu1  ;;  %v3445_v1 = vpop.f32.mrf.mxu0  ;;  %v2309_v42 = vsel %vm675_vm2, %v2306_v26, %v2308_v52  ;;  %v2311_v14 = vsel %vm675_vm2, %v2308_v52, %v2310_v48 }
 0x23d   :  { %v2318_v60 = vrot.slane %v3445_v1, 1  ;;  %v4645_v62 = vadd.f32 %v2309_v42, %v1928_v19  ;;  %v4647_v25 = vadd.f32 %v2311_v14, %v1931_v17 }
 0x23e   :  { %v1944_v30 = vpop.f32.mrf.mxu1  ;;  %v2152_v6 = vpop.f32.mrf.mxu0 }
 0x23f   :  { %v4649_v18 = vadd.f32 %v3401_v39, %v2318_v60  ;;  %v2314_v21 = vrot.slane %v2152_v6, 1 }
 0x240   :  { %v3402_v31 = vpop.f32.mrf.mxu1  ;;  %v3446_v13 = vpop.f32.mrf.mxu0 }
 0x241   :  { %v2315_v10 = vsel %vm675_vm2, %v2312_v9, %v2314_v21 }
 0x242   :  { %v4652_v36 = vadd.f32 %v3398_v5, %v2315_v10  ;;  %v2155_v46 = vpop.f32.mrf.mxu0  ;;  %v1947_v57 = vpop.f32.mrf.mxu1 }
 0x243   :  { %v2316_v15 = vrot.slane %v2155_v46, 1 }
 0x245   :  { %v2317_v11 = vsel %vm675_vm2, %v2314_v21, %v2316_v15  ;;  %v2319_v8 = vsel %vm675_vm2, %v2316_v15, %v2318_v60 }
 0x246   :  { %v4656_v54 = vadd.f32 %v2317_v11, %v1944_v30  ;;  %v4658_v34 = vadd.f32 %v2319_v8, %v1947_v57 }
 0x249   :  { %v3405_v12 = vpop.f32.mrf.mxu1  ;;  %v3449_v56 = vpop.f32.mrf.mxu0 }
 0x24a   :  { %v2323_v0 = vrot.slane %v3449_v56, 1 }
 0x24b   :  { %v1959_v33 = vpop.f32.mrf.mxu1  ;;  %v2167_v51 = vpop.f32.mrf.mxu0 }
 0x24c   :  { %v2320_v59 = vrot.slane %v2167_v51, 1 }
 0x24d   :  { %v3406_v22 = vpop.f32.mrf.mxu1  ;;  %v3450_v32 = vpop.f32.mrf.mxu0 }
 0x24e   :  { %v2325_v27 = vrot.slane %v3450_v32, 1 }
 0x24f   :  { %v1962_v7 = vpop.f32.mrf.mxu1  ;;  %v2170_v38 = vpop.f32.mrf.mxu0 }
 0x250   :  { %v2326_v43 = vsel %vm675_vm2, %v2323_v0, %v2325_v27  ;;  %v2321_v53 = vrot.slane %v2170_v38, 1 }
 0x251   :  { %v4661_v3 = vadd.f32 %v3405_v12, %v2326_v43  ;;  %v3409_v61 = vpop.f32.mrf.mxu1  ;;  %v3453_v63 = vpop.f32.mrf.mxu0 }
 0x252   :  { %v2322_v49 = vsel %vm675_vm2, %v2320_v59, %v2321_v53  ;;  %v2324_v19 = vsel %vm675_vm2, %v2321_v53, %v2323_v0  ;;  %v2331_v17 = vrot.slane %v3453_v63, 1 }
 0x253   :  { %v4665_v50 = vadd.f32 %v2322_v49, %v1959_v33  ;;  %v4667_v26 = vadd.f32 %v2324_v19, %v1962_v7  ;;  %v1975_v5 = vpop.f32.mrf.mxu1  ;;  %v2183_v16 = vpop.f32.mrf.mxu0 }
 0x254   :  { %v2327_v48 = vrot.slane %v2183_v16, 1 }
 0x255   :  { %v3410_v37 = vpop.f32.mrf.mxu1  ;;  %v3454_v9 = vpop.f32.mrf.mxu0 }
 0x256   :  { %v2328_v29 = vsel %vm675_vm2, %v2325_v27, %v2327_v48  ;;  %v2333_v24 = vrot.slane %v3454_v9, 1 }
 0x257   :  { %v4670_v52 = vadd.f32 %v3406_v22, %v2328_v29  ;;  %v1978_v39 = vpop.f32.mrf.mxu1  ;;  %v2186_v1 = vpop.f32.mrf.mxu0 }
 0x258   :  { %v2334_v42 = vsel %vm675_vm2, %v2331_v17, %v2333_v24  ;;  %v2329_v14 = vrot.slane %v2186_v1, 1 }
 0x259   :  { %v4673_v60 = vadd.f32 %v3409_v61, %v2334_v42  ;;  %v3413_v30 = vpop.f32.mrf.mxu1  ;;  %v3457_v6 = vpop.f32.mrf.mxu0 }
 0x25a   :  { %v2330_v21 = vsel %vm675_vm2, %v2327_v48, %v2329_v14  ;;  %v2332_v31 = vsel %vm675_vm2, %v2329_v14, %v2331_v17  ;;  %v2339_v12 = vrot.slane %v3457_v6, 1 }
 0x25b   :  { %v4677_v13 = vadd.f32 %v2330_v21, %v1975_v5  ;;  %v4679_v10 = vadd.f32 %v2332_v31, %v1978_v39  ;;  %v1991_v46 = vpop.f32.mrf.mxu1  ;;  %v2199_v15 = vpop.f32.mrf.mxu0 }
 0x25c   :  { %v2335_v57 = vrot.slane %v2199_v15, 1 }
 0x25d   :  { %v3414_v11 = vpop.f32.mrf.mxu1  ;;  %v3458_v8 = vpop.f32.mrf.mxu0 }
 0x25e   :  { %v2336_v56 = vsel %vm675_vm2, %v2333_v24, %v2335_v57  ;;  %v2341_v33 = vrot.slane %v3458_v8, 1 }
 0x25f   :  { %v4682_v51 = vadd.f32 %v3410_v37, %v2336_v56  ;;  %v1994_v22 = vpop.f32.mrf.mxu1  ;;  %v2202_v32 = vpop.f32.mrf.mxu0 }
 0x260   :  { %v2342_v0 = vsel %vm675_vm2, %v2339_v12, %v2341_v33  ;;  %v2337_v27 = vrot.slane %v2202_v32, 1 }
 0x261   :  { %v4685_v7 = vadd.f32 %v3413_v30, %v2342_v0  ;;  %v3417_v38 = vpop.f32.mrf.mxu1  ;;  %v3461_v59 = vpop.f32.mrf.mxu0 }
 0x262   :  { %v2338_v43 = vsel %vm675_vm2, %v2335_v57, %v2337_v27  ;;  %v2340_v53 = vsel %vm675_vm2, %v2337_v27, %v2339_v12  ;;  %v2347_v37 = vrot.slane %v3461_v59, 1 }
 0x263   :  { %v4689_v61 = vadd.f32 %v2338_v43, %v1991_v46  ;;  %v4691_v63 = vadd.f32 %v2340_v53, %v1994_v22  ;;  %v2007_v49 = vpop.f32.mrf.mxu1  ;;  %v2215_v19 = vpop.f32.mrf.mxu0 }
 0x264   :  { %v2343_v5 = vrot.slane %v2215_v19, 1 }
 0x265   :  { %v3418_v16 = vpop.f32.mrf.mxu1  ;;  %v3462_v48 = vpop.f32.mrf.mxu0 }
 0x266   :  { %v2344_v9 = vsel %vm675_vm2, %v2341_v33, %v2343_v5  ;;  %v2349_v17 = vrot.slane %v3462_v48, 1 }
 0x267   :  { %v4694_v29 = vadd.f32 %v3414_v11, %v2344_v9  ;;  %v2010_v24 = vpop.f32.mrf.mxu1  ;;  %v2218_v39 = vpop.f32.mrf.mxu0 }
 0x268   :  { %v2350_v1 = vsel %vm675_vm2, %v2347_v37, %v2349_v17  ;;  %v2345_v42 = vrot.slane %v2218_v39, 1 }
 0x269   :  { %v4697_v14 = vadd.f32 %v3417_v38, %v2350_v1  ;;  %v3421_v30 = vpop.f32.mrf.mxu1  ;;  %v3465_v6 = vpop.f32.mrf.mxu0 }
 0x26a   :  { %v2346_v21 = vsel %vm675_vm2, %v2343_v5, %v2345_v42  ;;  %v2348_v31 = vsel %vm675_vm2, %v2345_v42, %v2347_v37  ;;  %v2355_v46 = vrot.slane %v3465_v6, 1 }
 0x26b   :  { %v4701_v15 = vadd.f32 %v2346_v21, %v2007_v49  ;;  %v4703_v57 = vadd.f32 %v2348_v31, %v2010_v24  ;;  %v2023_v11 = vpop.f32.mrf.mxu1  ;;  %v2231_v8 = vpop.f32.mrf.mxu0 }
 0x26c   :  { %v4705_v12 = vadd.f32 %v3421_v30, %v2355_v46  ;;  %v2351_v56 = vrot.slane %v2231_v8, 1 }
 0x26d   :  { %v3422_v33 = vpop.f32.mrf.mxu1  ;;  %v3466_v22 = vpop.f32.mrf.mxu0 }
 0x26e   :  { %v2352_v32 = vsel %vm675_vm2, %v2349_v17, %v2351_v56 }
 0x26f   :  { %v4708_v0 = vadd.f32 %v3418_v16, %v2352_v32  ;;  %v2026_v27 = vpop.f32.mrf.mxu1  ;;  %v2234_v38 = vpop.f32.mrf.mxu0 }
 0x270   :  { %v2353_v59 = vrot.slane %v2234_v38, 1 }
 0x271   :  { %v3473_v43 = vpop.f32.mrf.mxu1 }
 0x272   :  { %v2354_v53 = vsel %vm675_vm2, %v2351_v56, %v2353_v59  ;;  %v2356_v49 = vsel %vm675_vm2, %v2353_v59, %v2355_v46  ;;  %v2682_v9 = vrot.slane %v3473_v43, 2 }
 0x273   :  { %v4712_v19 = vadd.f32 %v2354_v53, %v2023_v11  ;;  %v4714_v5 = vadd.f32 %v2356_v49, %v2026_v27  ;;  %v2484_v48 = vpop.f32.mrf.mxu1 }
 0x274   :  { %v2679_v17 = vrot.slane %v2484_v48, 2 }
 0x275   :  { %v3474_v37 = vpop.f32.mrf.mxu1 }
 0x276   :  { %v2684_v24 = vrot.slane %v3474_v37, 2 }
 0x277   :  { %v2487_v39 = vpop.f32.mrf.mxu1 }
 0x278   :  { %v2685_v16 = vsel %vm1071_vm3, %v2682_v9, %v2684_v24  ;;  %v2680_v1 = vrot.slane %v2487_v39, 2 }
 0x279   :  { %v2793_v42 = vadd.f32 %v2685_v16, %v4605_v47  ;;  %v3477_v30 = vpop.f32.mrf.mxu1 }
 0x27a   :  { %v2681_v6 = vsel %vm1071_vm3, %v2679_v17, %v2680_v1  ;;  %v2683_v21 = vsel %vm1071_vm3, %v2680_v1, %v2682_v9  ;;  %v2690_v27 = vrot.slane %v3477_v30, 2 }
 0x27b   :  { %v2791_v31 = vadd.f32 %v2681_v6, %v4609_v20  ;;  %v2792_v46 = vadd.f32 %v2683_v21, %v4611_v44  ;;  %v2500_v11 = vpop.f32.mrf.mxu1  ;;  %v2832_v56 = vsel %vm2829_vm12, %v2793_v42, -inf }
 0x27c   :  { %v2686_v8 = vrot.slane %v2500_v11, 2 }
 0x27d   :  { %v2830_v33 = vsel %vm2829_vm12, %v2791_v31, -inf  ;;  %v3478_v22 = vpop.f32.mrf.mxu1  ;;  %v2831_v44 = vsel %vm2829_vm12, %v2792_v46, -inf }
 0x27e   :  { %v2833_v32 = vmax.f32 %v2830_v33, %v2832_v56  ;;  %v2687_v47 = vsel %vm1071_vm3, %v2684_v24, %v2686_v8  ;;  %v2692_v38 = vrot.slane %v3478_v22, 2 }
 0x27f   :  { %v2794_v59 = vadd.f32 %v2687_v47, %v4614_v40  ;;  %v2503_v43 = vpop.f32.mrf.mxu1 }
 0x280   :  { %v2693_v53 = vsel %vm1071_vm3, %v2690_v27, %v2692_v38  ;;  %v2688_v20 = vrot.slane %v2503_v43, 2 }
 0x281   :  { %v2834_v49 = vsel %vm2829_vm12, %v2794_v59, -inf  ;;  %v3481_v48 = vpop.f32.mrf.mxu1  ;;  %v2797_v17 = vadd.f32 %v2693_v53, %v4617_v28 }
 0x282   :  { %v2835_v37 = vmax.f32 %v2831_v44, %v2834_v49  ;;  %v2689_v9 = vsel %vm1071_vm3, %v2686_v8, %v2688_v20  ;;  %v2691_v39 = vsel %vm1071_vm3, %v2688_v20, %v2690_v27  ;;  %v2698_v6 = vrot.slane %v3481_v48, 2 }
 0x283   :  { %v2795_v24 = vadd.f32 %v2689_v9, %v4621_v55  ;;  %v2796_v40 = vadd.f32 %v2691_v39, %v4623_v2  ;;  %v2516_v16 = vpop.f32.mrf.mxu1  ;;  %v2840_v56 = vsel %vm2829_vm12, %v2797_v17, -inf }
 0x284   :  { %v2694_v1 = vrot.slane %v2516_v16, 2 }
 0x285   :  { %v2836_v42 = vsel %vm2829_vm12, %v2795_v24, -inf  ;;  %v2838_v30 = vsel %vm2829_vm12, %v2796_v40, -inf  ;;  %v3482_v21 = vpop.f32.mrf.mxu1 }
 0x286   :  { %v2837_v31 = vmax.f32 %v2833_v32, %v2836_v42  ;;  %v2839_v46 = vmax.f32 %v2835_v37, %v2838_v30  ;;  %v2695_v11 = vsel %vm1071_vm3, %v2692_v38, %v2694_v1  ;;  %v2700_v8 = vrot.slane %v3482_v21, 2 }
 0x287   :  { %v2798_v28 = vadd.f32 %v2695_v11, %v4626_v45  ;;  %v2519_v55 = vpop.f32.mrf.mxu1 }
 0x288   :  { %v2701_v2 = vsel %vm1071_vm3, %v2698_v6, %v2700_v8  ;;  %v2696_v33 = vrot.slane %v2519_v55, 2  ;;  %v2841_v22 = vmax.f32 %v2837_v31, %v2840_v56 }
 0x289   :  { %v2842_v27 = vsel %vm2829_vm12, %v2798_v28, -inf  ;;  %v3485_v47 = vpop.f32.mrf.mxu1  ;;  %v2801_v38 = vadd.f32 %v2701_v2, %v4629_v35 }
 0x28a   :  { %v2843_v59 = vmax.f32 %v2839_v46, %v2842_v27  ;;  %v2697_v43 = vsel %vm1071_vm3, %v2694_v1, %v2696_v33  ;;  %v2699_v32 = vsel %vm1071_vm3, %v2696_v33, %v2698_v6  ;;  %v2706_v37 = vrot.slane %v3485_v47, 2 }
 0x28b   :  { %v2799_v53 = vadd.f32 %v2697_v43, %v4633_v41  ;;  %v2800_v20 = vadd.f32 %v2699_v32, %v4635_v23  ;;  %v2532_v45 = vpop.f32.mrf.mxu1  ;;  %v2848_v16 = vsel %vm2829_vm12, %v2801_v38, -inf }
 0x28c   :  { %v2702_v44 = vrot.slane %v2532_v45, 2 }
 0x28d   :  { %v2844_v49 = vsel %vm2829_vm12, %v2799_v53, -inf  ;;  %v2846_v48 = vsel %vm2829_vm12, %v2800_v20, -inf  ;;  %v3486_v9 = vpop.f32.mrf.mxu1 }
 0x28e   :  { %v2845_v39 = vmax.f32 %v2841_v22, %v2844_v49  ;;  %v2847_v17 = vmax.f32 %v2843_v59, %v2846_v48  ;;  %v2703_v24 = vsel %vm1071_vm3, %v2700_v8, %v2702_v44  ;;  %v2708_v40 = vrot.slane %v3486_v9, 2 }
 0x28f   :  { %v2802_v35 = vadd.f32 %v2703_v24, %v4638_v4  ;;  %v2535_v41 = vpop.f32.mrf.mxu1 }
 0x290   :  { %v2709_v23 = vsel %vm1071_vm3, %v2706_v37, %v2708_v40  ;;  %v2704_v1 = vrot.slane %v2535_v41, 2  ;;  %v2849_v42 = vmax.f32 %v2845_v39, %v2848_v16 }
 0x291   :  { %v2850_v30 = vsel %vm2829_vm12, %v2802_v35, -inf  ;;  %v3489_v6 = vpop.f32.mrf.mxu1  ;;  %v2805_v11 = vadd.f32 %v2709_v23, %v4641_v58 }
 0x292   :  { %v2851_v21 = vmax.f32 %v2847_v17, %v2850_v30  ;;  %v2705_v31 = vsel %vm1071_vm3, %v2702_v44, %v2704_v1  ;;  %v2707_v46 = vsel %vm1071_vm3, %v2704_v1, %v2706_v37  ;;  %v2714_v43 = vrot.slane %v3489_v6, 2 }
 0x293   :  { %v2803_v8 = vadd.f32 %v2705_v31, %v4645_v62  ;;  %v2804_v56 = vadd.f32 %v2707_v46, %v4647_v25  ;;  %v2548_v4 = vpop.f32.mrf.mxu1  ;;  %v2856_v59 = vsel %vm2829_vm12, %v2805_v11, -inf }
 0x294   :  { %v2710_v28 = vrot.slane %v2548_v4, 2  ;;  %v2809_v49 = vadd.f32 %v2714_v43, %v4649_v18 }
 0x295   :  { %v2852_v55 = vsel %vm2829_vm12, %v2803_v8, -inf  ;;  %v2854_v2 = vsel %vm2829_vm12, %v2804_v56, -inf  ;;  %v3490_v33 = vpop.f32.mrf.mxu1 }
 0x296   :  { %v2853_v22 = vmax.f32 %v2849_v42, %v2852_v55  ;;  %v2855_v27 = vmax.f32 %v2851_v21, %v2854_v2  ;;  %v2711_v47 = vsel %vm1071_vm3, %v2708_v40, %v2710_v28  ;;  %v2865_v41 = vsel %vm2864_vm13, %v2809_v49, -inf }
 0x297   :  { %v2806_v58 = vadd.f32 %v2711_v47, %v4652_v36  ;;  %v2551_v32 = vpop.f32.mrf.mxu1 }
 0x298   :  { %v2712_v62 = vrot.slane %v2551_v32, 2  ;;  %v2857_v38 = vmax.f32 %v2853_v22, %v2856_v59 }
 0x299   :  { %v2858_v25 = vsel %vm2829_vm12, %v2806_v58, -inf  ;;  %v3493_v53 = vpop.f32.mrf.mxu1 }
 0x29a   :  { %v2859_v20 = vmax.f32 %v2855_v27, %v2858_v25  ;;  %v2713_v45 = vsel %vm1071_vm3, %v2710_v28, %v2712_v62  ;;  %v2715_v44 = vsel %vm1071_vm3, %v2712_v62, %v2714_v43  ;;  %v2719_v16 = vrot.slane %v3493_v53, 2 }
 0x29b   :  { %v2807_v48 = vadd.f32 %v2713_v45, %v4656_v54  ;;  %v2808_v37 = vadd.f32 %v2715_v44, %v4658_v34  ;;  %v2563_v9 = vpop.f32.mrf.mxu1 }
 0x29c   :  { %v2716_v18 = vrot.slane %v2563_v9, 2 }
 0x29d   :  { %v2860_v36 = vsel %vm2829_vm12, %v2807_v48, -inf  ;;  %v2862_v39 = vsel %vm2829_vm12, %v2808_v37, -inf  ;;  %v3494_v17 = vpop.f32.mrf.mxu1 }
 0x29e   :  { %v2861_v24 = vmax.f32 %v2857_v38, %v2860_v36  ;;  %v2863_v40 = vmax.f32 %v2859_v20, %v2862_v39  ;;  %v2721_v35 = vrot.slane %v3494_v17, 2 }
 0x29f   :  { %v2566_v23 = vpop.f32.mrf.mxu1 }
 0x2a0   :  { %v2866_v1 = vmax.f32 %v2861_v24, %v2865_v41  ;;  %v2722_v54 = vsel %vm1071_vm3, %v2719_v16, %v2721_v35  ;;  %v2717_v42 = vrot.slane %v2566_v23, 2 }
 0x2a1   :  { %v2812_v34 = vadd.f32 %v2722_v54, %v4661_v3  ;;  %v3497_v30 = vpop.f32.mrf.mxu1 }
 0x2a2   :  { %v4774_v6 = vmax.f32 %v2866_v1, %v2863_v40  ;;  %v2718_v21 = vsel %vm1071_vm3, %v2716_v18, %v2717_v42  ;;  %v2720_v31 = vsel %vm1071_vm3, %v2717_v42, %v2719_v16  ;;  %v2727_v3 = vrot.slane %v3497_v30, 2 }
 0x2a3   :  { %v2810_v46 = vadd.f32 %v2718_v21, %v4665_v50  ;;  %v2579_v11 = vpop.f32.mrf.mxu1  ;;  %v2876_v56 = vsel %vm2829_vm12, %v2812_v34, -inf  ;;  %v2811_v4 = vadd.f32 %v2720_v31, %v4667_v26 }
 0x2a4   :  { %v2723_v8 = vrot.slane %v2579_v11, 2 }
 0x2a5   :  { %v2874_v28 = vsel %vm2829_vm12, %v2810_v46, -inf  ;;  %v3498_v55 = vpop.f32.mrf.mxu1  ;;  %v2875_v43 = vsel %vm2829_vm12, %v2811_v4, -inf }
 0x2a6   :  { %v2877_v2 = vmax.f32 %v2874_v28, %v2876_v56  ;;  %v2724_v33 = vsel %vm1071_vm3, %v2721_v35, %v2723_v8  ;;  %v2729_v22 = vrot.slane %v3498_v55, 2 }
 0x2a7   :  { %v2813_v27 = vadd.f32 %v2724_v33, %v4670_v52  ;;  %v2582_v47 = vpop.f32.mrf.mxu1 }
 0x2a8   :  { %v2730_v59 = vsel %vm1071_vm3, %v2727_v3, %v2729_v22  ;;  %v2725_v50 = vrot.slane %v2582_v47, 2 }
 0x2a9   :  { %v2878_v58 = vsel %vm2829_vm12, %v2813_v27, -inf  ;;  %v3501_v32 = vpop.f32.mrf.mxu1  ;;  %v2816_v25 = vadd.f32 %v2730_v59, %v4673_v60 }
 0x2aa   :  { %v2879_v26 = vmax.f32 %v2875_v43, %v2878_v58  ;;  %v2726_v62 = vsel %vm1071_vm3, %v2723_v8, %v2725_v50  ;;  %v2728_v38 = vsel %vm1071_vm3, %v2725_v50, %v2727_v3  ;;  %v2735_v48 = vrot.slane %v3501_v32, 2 }
 0x2ab   :  { %v2814_v53 = vadd.f32 %v2726_v62, %v4677_v13  ;;  %v2815_v52 = vadd.f32 %v2728_v38, %v4679_v10  ;;  %v2595_v20 = vpop.f32.mrf.mxu1  ;;  %v2884_v24 = vsel %vm2829_vm12, %v2816_v25, -inf }
 0x2ac   :  { %v2731_v45 = vrot.slane %v2595_v20, 2 }
 0x2ad   :  { %v2880_v44 = vsel %vm2829_vm12, %v2814_v53, -inf  ;;  %v2882_v49 = vsel %vm2829_vm12, %v2815_v52, -inf  ;;  %v3502_v37 = vpop.f32.mrf.mxu1 }
 0x2ae   :  { %v2881_v9 = vmax.f32 %v2877_v2, %v2880_v44  ;;  %v2883_v36 = vmax.f32 %v2879_v26, %v2882_v49  ;;  %v2732_v39 = vsel %vm1071_vm3, %v2729_v22, %v2731_v45  ;;  %v2737_v17 = vrot.slane %v3502_v37, 2 }
 0x2af   :  { %v2817_v60 = vadd.f32 %v2732_v39, %v4682_v51  ;;  %v2598_v13 = vpop.f32.mrf.mxu1 }
 0x2b0   :  { %v2738_v10 = vsel %vm1071_vm3, %v2735_v48, %v2737_v17  ;;  %v2733_v40 = vrot.slane %v2598_v13, 2  ;;  %v2885_v16 = vmax.f32 %v2881_v9, %v2884_v24 }
 0x2b1   :  { %v2886_v35 = vsel %vm2829_vm12, %v2817_v60, -inf  ;;  %v3505_v41 = vpop.f32.mrf.mxu1  ;;  %v2820_v54 = vadd.f32 %v2738_v10, %v4685_v7 }
 0x2b2   :  { %v2887_v23 = vmax.f32 %v2883_v36, %v2886_v35  ;;  %v2734_v1 = vsel %vm1071_vm3, %v2731_v45, %v2733_v40  ;;  %v2736_v18 = vsel %vm1071_vm3, %v2733_v40, %v2735_v48  ;;  %v2743_v46 = vrot.slane %v3505_v41, 2 }
 0x2b3   :  { %v2818_v42 = vadd.f32 %v2734_v1, %v4689_v61  ;;  %v2819_v34 = vadd.f32 %v2736_v18, %v4691_v63  ;;  %v2611_v51 = vpop.f32.mrf.mxu1  ;;  %v2892_v55 = vsel %vm2829_vm12, %v2820_v54, -inf  ;;  %v2868_v48 = vrot.slane %v4774_v6, 4 }
 0x2b4   :  { %v2739_v30 = vrot.slane %v2611_v51, 2 }
 0x2b5   :  { %v2888_v21 = vsel %vm2829_vm12, %v2818_v42, -inf  ;;  %v2890_v31 = vsel %vm2829_vm12, %v2819_v34, -inf  ;;  %v3506_v11 = vpop.f32.mrf.mxu1  ;;  %v2869_v13 = vmax.f32 %v4774_v6, %v2868_v48  ;;  %v3114_v6 = vld [vmem:[%s4842_s4] ss:$0 sm:$0xff] }
 0x2b6   :  { %v2889_v8 = vmax.f32 %v2885_v16, %v2888_v21  ;;  %v2891_v56 = vmax.f32 %v2887_v23, %v2890_v31  ;;  %v2740_v4 = vsel %vm1071_vm3, %v2737_v17, %v2739_v30  ;;  %v2745_v28 = vrot.slane %v3506_v11, 2 }
 0x2b7   :  { %v2821_v7 = vadd.f32 %v2740_v4, %v4694_v29  ;;  %v2614_v61 = vpop.f32.mrf.mxu1  ;;  %v2870_v23 = vrot.slane %v2869_v13, 2 }
 0x2b8   :  { %v2746_v63 = vsel %vm1071_vm3, %v2743_v46, %v2745_v28  ;;  %v2741_v2 = vrot.slane %v2614_v61, 2  ;;  %v2893_v3 = vmax.f32 %v2889_v8, %v2892_v55 }
 0x2b9   :  { %v2894_v33 = vsel %vm2829_vm12, %v2821_v7, -inf  ;;  %v3509_v22 = vpop.f32.mrf.mxu1  ;;  %v2824_v50 = vadd.f32 %v2746_v63, %v4697_v14 }
 0x2ba   :  { %v2895_v27 = vmax.f32 %v2891_v56, %v2894_v33  ;;  %v2742_v47 = vsel %vm1071_vm3, %v2739_v30, %v2741_v2  ;;  %v2744_v59 = vsel %vm1071_vm3, %v2741_v2, %v2743_v46  ;;  %v2751_v45 = vrot.slane %v3509_v22, 2 }
 0x2bb   :  { %v2822_v43 = vadd.f32 %v2742_v47, %v4701_v15  ;;  %v2823_v58 = vadd.f32 %v2744_v59, %v4703_v57  ;;  %v2627_v29 = vpop.f32.mrf.mxu1  ;;  %v2900_v20 = vsel %vm2829_vm12, %v2824_v50, -inf }
 0x2bc   :  { %v2747_v32 = vrot.slane %v2627_v29, 2  ;;  %v2828_v39 = vadd.f32 %v2751_v45, %v4705_v12  ;;  %v2871_v12 = vmax.f32 %v2869_v13, %v2870_v23 }
 0x2bd   :  { %v2896_v26 = vsel %vm2829_vm12, %v2822_v43, -inf  ;;  %v2898_v62 = vsel %vm2829_vm12, %v2823_v58, -inf  ;;  %v3510_v38 = vpop.f32.mrf.mxu1 }
 0x2be   :  { %v2897_v25 = vmax.f32 %v2893_v3, %v2896_v26  ;;  %v2899_v53 = vmax.f32 %v2895_v27, %v2898_v62  ;;  %v2748_v52 = vsel %vm1071_vm3, %v2745_v28, %v2747_v32  ;;  %v2908_v16 = vsel %vm2864_vm13, %v2828_v39, -inf }
 0x2bf   :  { %v2825_v14 = vadd.f32 %v2748_v52, %v4708_v0  ;;  %v2630_v44 = vpop.f32.mrf.mxu1 }
 0x2c0   :  { %v2749_v15 = vrot.slane %v2630_v44, 2  ;;  %v2901_v49 = vmax.f32 %v2897_v25, %v2900_v20 }
 0x2c1   :  { %v2902_v57 = vsel %vm2829_vm12, %v2825_v14, -inf }
 0x2c2   :  { %v2903_v37 = vmax.f32 %v2899_v53, %v2902_v57  ;;  %v2750_v9 = vsel %vm1071_vm3, %v2747_v32, %v2749_v15  ;;  %v2752_v36 = vsel %vm1071_vm3, %v2749_v15, %v2751_v45 }
 0x2c3   :  { %v2826_v17 = vadd.f32 %v2750_v9, %v4712_v19  ;;  %v2827_v24 = vadd.f32 %v2752_v36, %v4714_v5  ;;  %v2872_v19 = vrot.slane %v2871_v12, 1 }
 0x2c5   :  { %v2904_v0 = vsel %vm2829_vm12, %v2826_v17, -inf  ;;  %v2906_v60 = vsel %vm2829_vm12, %v2827_v24, -inf  ;;  %v2873_v34 = vmax.f32 %v2871_v12, %v2872_v19 }
 0x2c6   :  { %v2905_v10 = vmax.f32 %v2901_v49, %v2904_v0  ;;  %v2907_v40 = vmax.f32 %v2903_v37, %v2906_v60 }
 0x2c7   :  { %v2924_v21 = vadd.f32 %v3114_v6, %v2873_v34 }
 0x2c8   :  { %v2909_v35 = vmax.f32 %v2905_v10, %v2908_v16 }
 0x2ca   :  { %v2910_v41 = vmax.f32 %v2909_v35, %v2907_v40 }
 0x2cc   :  { %v2911_v1 = vrot.slane %v2910_v41, 4 }
 0x2ce   :  { %v2912_v18 = vmax.f32 %v2910_v41, %v2911_v1 }
 0x2d0   :  { %v2913_v54 = vrot.slane %v2912_v18, 2 }
 0x2d2   :  { %v2914_v42 = vmax.f32 %v2912_v18, %v2913_v54 }
 0x2d4   :  { %v2915_v5 = vrot.slane %v2914_v42, 1 }
 0x2d6   :  { %v2916_v51 = vmax.f32 %v2914_v42, %v2915_v5 }
 0x2d8   :  { %v2925_v30 = vadd.f32 %v3114_v6, %v2916_v51 }
 0x2da   :  { %v2928_v31 = vrot.slane %v2925_v30, 7 }
 0x2dc   :  { %v2930_v46 = vsel %vm2929_vm14, %v2928_v31, %v2924_v21 }
 0x2dd   :  { %2933 = vst.msk [vmem:[#allocation2] sm:$0x3] %vm2932_vm15, %v2930_v46 }
 0x2de   :  { %3558 = shalt.err (!%p3555_p4)
}
 0x2df   :  { %2943 = dma.vmem_to_hbm [thread:$0]  %s2941_s16, 32, %s4843_s5, [#allocation3]  }
 0x2e0   :  { %3567 = dma.done.wait [#allocation3], 32  }
 0x2e1   :  { %3568 = vsyncadd [#allocation3], 4294967264 }
 0x2e2   :  { %2947 = vsyncpa [#allocation3], 1 }

</bundles_post_ra>
